<compile_context>
chip_gen: v7x
topology: tpu7x:2x2x1
jax: 0.10.0
libtpu: 0.0.40
codegen_flags: <defaults>
</compile_context>

<pallas_src>
import functools

import numpy as np
import jax
import jax.numpy as jnp
from jax import lax
from jax.experimental import pallas as pl
from jax.experimental.pallas import tpu as pltpu


def _round_up(x, m):
    return (x + m - 1) // m * m


# ----------------------- constant matrix builders (host) ------------------ #
def _bilinear_matrix(n_out, n_in):
    """align_corners=True bilinear interpolation matrix of shape (n_out, n_in)."""
    m = np.zeros((n_out, n_in), np.float32)
    if n_in == 1 or n_out == 1:
        m[:, 0] = 1.0
        return m
    scale = (n_in - 1) / (n_out - 1)
    for i in range(n_out):
        src = i * scale
        i0 = min(int(np.floor(src)), n_in - 1)
        i1 = min(i0 + 1, n_in - 1)
        w = src - i0
        m[i, i0] += 1.0 - w
        m[i, i1] += w
    return m


def _upsample_pad_matrix(hx, wx, hs, ws, pad_top, pad_left):
    """(hx*wx, (hs+2)*(ws+2)): bilinear x2 upsample + F.pad(diff) + 1px conv halo
    folded into one matrix (negative diff == crop is handled too)."""
    hp, wp = hs + 2, ws + 2
    rows = _bilinear_matrix(2 * hx, hx)            # (Ho, hx)
    cols = _bilinear_matrix(2 * wx, wx)            # (Wo, wx)
    rp = np.zeros((hp, hx), np.float32)
    cp = np.zeros((wp, wx), np.float32)
    for i in range(hs):
        src = i - pad_top
        if 0 <= src < 2 * hx:
            rp[i + 1] = rows[src]
    for j in range(ws):
        src = j - pad_left
        if 0 <= src < 2 * wx:
            cp[j + 1] = cols[src]
    m = np.einsum("ih,jw->hwij", rp, cp).reshape(hx * wx, hp * wp)
    return np.ascontiguousarray(m, np.float32)


def _halo_pad_matrix(hs, ws):
    """(hs*ws, (hs+2)*(ws+2)): zero-pad a flattened image by 1px on each side."""
    hp, wp = hs + 2, ws + 2
    m = np.zeros((hs * ws, hp * wp), np.float32)
    for y in range(hs):
        for x in range(ws):
            m[y * ws + x, (y + 1) * wp + (x + 1)] = 1.0
    return m


def _compact_rehalo_matrix(hs, ws):
    """((hs+2)*(ws+2), (hs+2)*(ws+2)): fused 'select valid conv outputs' +
    're-pad with a 1px halo' (conv output at padded-flat lane y*wp+x moves to
    padded-flat lane (y+1)*wp+(x+1); halo/tail lanes get all-zero columns)."""
    hp, wp = hs + 2, ws + 2
    m = np.zeros((hp * wp, hp * wp), np.float32)
    for y in range(hs):
        for x in range(ws):
            m[y * wp + x, (y + 1) * wp + (x + 1)] = 1.0
    return m


def _compact_matrix(hs, ws):
    """((hs+2)*(ws+2), hs*ws): select valid conv outputs from padded-flat coords."""
    hp, wp = hs + 2, ws + 2
    m = np.zeros((hp * wp, hs * ws), np.float32)
    for y in range(hs):
        for x in range(ws):
            m[y * wp + x, y * ws + x] = 1.0
    return m


@functools.lru_cache(maxsize=None)
def _build_constants(hx, wx, hs, ws, batch):
    """All shape-dependent constant matrices, lane-padded to multiples of 128
    and (for batch>1) expanded block-diagonally so B images ride the lane axis."""
    hw = hs * ws
    hxwx = hx * wx
    npad_raw = (hs + 2) * (ws + 2)
    NP = _round_up(npad_raw, 128)          # padded-halo lane extent (324 -> 384)
    IN_L = _round_up(hw + hxwx, 128)       # stacked-input lane extent
    pad_top = (hs - 2 * hx) // 2
    pad_left = (ws - 2 * wx) // 2

    m_up = _upsample_pad_matrix(hx, wx, hs, ws, pad_top, pad_left)   # (hxwx, 324)
    m_pad = _halo_pad_matrix(hs, ws)                                  # (hw,   324)

    # One staging matrix for the merged [shortcut ; x] operand: rows [0,hw)
    # pad the shortcut, rows [hw, hw+hxwx) upsample+pad x, rest is zero.
    m_in = np.zeros((IN_L, NP), np.float32)
    m_in[:hw, :npad_raw] = m_pad
    m_in[hw:hw + hxwx, :npad_raw] = m_up

    m_cp = np.zeros((NP, NP), np.float32)
    m_cp[:npad_raw, :npad_raw] = _compact_rehalo_matrix(hs, ws)

    m_cmp = np.zeros((NP, hw), np.float32)
    m_cmp[:npad_raw, :] = _compact_matrix(hs, ws)

    # Lane mask of interior (non-halo, non-tail) positions for the conv1 bias.
    mask = np.zeros((NP,), np.float32)
    wp = ws + 2
    for y in range(hs):
        for x in range(ws):
            mask[(y + 1) * wp + (x + 1)] = 1.0

    if batch > 1:
        eye = np.eye(batch, dtype=np.float32)
        m_in = np.kron(eye, m_in)
        m_cp = np.kron(eye, m_cp)
        m_cmp = np.kron(eye, m_cmp)
        mask = np.tile(mask, batch)

    return m_in, m_cp, m_cmp, mask, NP, IN_L


def _pick_images_per_step(n, max_b=4):
    """Batch images along the lane axis to amortize per-grid-step overhead, but
    keep >= 2 grid steps so the 'parallel' axis still feeds both TensorCores on
    v7x. max_b is modest: the block-diagonal constants grow as O(B^2)."""
    best = 1
    for b in range(1, min(n, max_b) + 1):
        if n % b == 0 and n // b >= 2:
            best = b
    return best


# ----------------------------- parameter prep ----------------------------- #
def fold_bn(gamma, beta, running_mean, running_var, eps=1e-5):
    scale = gamma / jnp.sqrt(running_var + eps)
    shift = beta - running_mean * scale
    return scale, shift


def _fold_flatten_weights(w_hwio, scale, cin_pad, cout_pad):
    """HWIO (3,3,cin,cout) -> (cout_pad, 9*cin_pad) bf16 with BN scale folded in.
    Row order inside K: tap k = dy*3+dx major, channel c minor. Channels and
    output rows are zero-padded so both convs share the same 8-row im2col tap
    blocks (the zero rows/columns are exactly the unused im2col rows)."""
    kh, kw, cin, cout = w_hwio.shape
    w = jnp.transpose(w_hwio, (3, 0, 1, 2)) * scale[:, None, None, None]
    w = w.reshape(cout, kh * kw, cin)
    w = jnp.pad(w, ((0, cout_pad - cout), (0, 0), (0, cin_pad - cin)))
    return w.reshape(cout_pad, kh * kw * cin_pad).astype(jnp.bfloat16)


# ------------------------------ Pallas kernel ------------------------------ #
def _make_up_kernel(cpad, lanes, shifts):
    def kernel(in_ref, min_ref, mcp_ref, mcmp_ref,
               w1_ref, b1_ref, w2_ref, b2_ref, o_ref, col_ref):

        def stage_taps(img):
            # img: (cpad, lanes) f32. One XLU roll + one full-width, 8-row
            # aligned store per tap (no masked vst.msk, no zero fill): wrapped
            # tail lanes are finite and only land at padded-flat positions that
            # the all-zero rows of m_cp / m_cmp never select. Every row of
            # col_ref is rewritten before each conv matmul reads it.
            for k, s in enumerate(shifts):
                shifted = img if s == 0 else pltpu.roll(img, shift=lanes - s, axis=1)
                col_ref[k * cpad:(k + 1) * cpad, :] = shifted

        # (1) bilinear x2 upsample + F.pad(diff) + 1px conv halo + channel
        #     concat of [shortcut ; up] in ONE bf16 matmul (block-stacked
        #     constant built on host).
        pad_all = jnp.dot(in_ref[0], min_ref[...],
                          preferred_element_type=jnp.float32)          # (cpad, lanes)

        # (2) conv1: im2col via rolls, whole 3x3xCin contraction in one MXU
        #     matmul (K = 9*cpad = 72, bf16 operands, f32 accumulate).
        stage_taps(pad_all)
        acc1 = jnp.dot(w1_ref[...], col_ref[...].astype(jnp.bfloat16),
                       preferred_element_type=jnp.float32)              # (cpad, lanes)
        # Fused compact + re-halo selection (exact 0/1 matrix, kept f32 to
        # avoid an extra bf16 rounding of the activations) + masked folded-BN
        # shift + ReLU: h1 comes out directly in padded-halo layout.
        h1 = jnp.maximum(
            jnp.dot(acc1, mcp_ref[...], preferred_element_type=jnp.float32)
            + b1_ref[...], 0.0)                                         # (cpad, lanes)

        # (3) conv2 on h1 (already padded); zero-padded rows of h1 line up
        #     with the zero input-channel columns of w2 (both padded to cpad).
        stage_taps(h1)
        acc2 = jnp.dot(w2_ref[...], col_ref[...].astype(jnp.bfloat16),
                       preferred_element_type=jnp.float32)              # (cout, lanes)
        y = jnp.dot(acc2, mcmp_ref[...],
                    preferred_element_type=jnp.float32)                 # (cout, B*hw)

        # Lane-dense store: last dim = B*hs*ws (multiple of 128).
        o_ref[0] = jnp.maximum(y + b2_ref[...], 0.0).astype(o_ref.dtype)

    return kernel


@jax.jit
def up_forward(x_nchw, shortcut_nchw, params):
    n, cx, hx, wx = x_nchw.shape
    _, cs, hs, ws = shortcut_nchw.shape
    cout = params["w1"].shape[-1]
    cb = cs + cx
    cpad = _round_up(max(cb, cout), 8)     # channels per im2col tap block
    hw = hs * ws
    hxwx = hx * wx
    wp = ws + 2

    B = _pick_images_per_step(n)
    steps = n // B

    m_in_np, m_cp_np, m_cmp_np, mask_np, NP, IN_L = _build_constants(hx, wx, hs, ws, B)
    lanes = B * NP
    in_lanes = B * IN_L
    out_lanes = B * hw

    # Data-carrying operands in bf16 (MXU native); exact 0/1 selection
    # matrices and bias epilogues stay f32.
    m_in = jnp.asarray(m_in_np, jnp.bfloat16)
    m_cp = jnp.asarray(m_cp_np, jnp.float32)
    m_cmp = jnp.asarray(m_cmp_np, jnp.float32)
    lane_mask = jnp.asarray(mask_np, jnp.float32)

    # Fold eval-mode BN scale into the conv weights; keep the shift as a bias.
    w1f = _fold_flatten_weights(params["w1"], params["scale1"], cpad, cpad)
    w2f = _fold_flatten_weights(params["w2"], params["scale2"], cpad, cout)
    shift1 = jnp.pad(params["shift1"].astype(jnp.float32), (0, cpad - cout))
    b1mask = shift1[:, None] * lane_mask[None, :]                  # (cpad, lanes)
    b2 = params["shift2"].reshape(cout, 1).astype(jnp.float32)

    # Merged staging operand: shortcut channels occupy lanes [0, hw), x
    # channels occupy lanes [hw, hw+hxwx); disjoint lane ranges let a single
    # block-stacked matmul perform pad + upsample + concat in-kernel.
    stacked = jnp.zeros((n, cpad, IN_L), jnp.bfloat16)
    stacked = stacked.at[:, :cs, :hw].set(
        shortcut_nchw.reshape(n, cs, hw).astype(jnp.bfloat16))
    stacked = stacked.at[:, cs:cb, hw:hw + hxwx].set(
        x_nchw.reshape(n, cx, hxwx).astype(jnp.bfloat16))
    # Group B images per grid step along the lane axis.
    stacked = stacked.reshape(steps, B, cpad, IN_L).transpose(0, 2, 1, 3)
    stacked = stacked.reshape(steps, cpad, in_lanes)

    shifts = [dy * wp + dx for dy in range(3) for dx in range(3)]
    kernel = _make_up_kernel(cpad, lanes, shifts)

    out_flat = pl.pallas_call(
        kernel,
        out_shape=jax.ShapeDtypeStruct((steps, cout, out_lanes), jnp.float32),
        grid_spec=pltpu.PrefetchScalarGridSpec(
            num_scalar_prefetch=0,
            grid=(steps,),
            in_specs=[
                pl.BlockSpec((1, cpad, in_lanes), lambda i: (i, 0, 0)),
                # Constant-index operands below are only DMA'd once.
                # TODO(synk): mark them pl.Buffered(1) / move to once-loaded
                # scratch if B or channel counts ever grow enough for their
                # default double buffer to matter on v7x's 64 MiB VMEM.
                pl.BlockSpec((in_lanes, lanes), lambda i: (0, 0)),
                pl.BlockSpec((lanes, lanes), lambda i: (0, 0)),
                pl.BlockSpec((lanes, out_lanes), lambda i: (0, 0)),
                pl.BlockSpec((cpad, 9 * cpad), lambda i: (0, 0)),
                pl.BlockSpec((cpad, lanes), lambda i: (0, 0)),
                pl.BlockSpec((cout, 9 * cpad), lambda i: (0, 0)),
                pl.BlockSpec((cout, 1), lambda i: (0, 0)),
            ],
            out_specs=pl.BlockSpec((1, cout, out_lanes), lambda i: (i, 0, 0)),
            scratch_shapes=[pltpu.VMEM((9 * cpad, lanes), jnp.float32)],
        ),
        compiler_params=pltpu.CompilerParams(
            dimension_semantics=("parallel",)),
    )(stacked, m_in, m_cp, m_cmp, w1f, b1mask, w2f, b2)

    out = out_flat.reshape(steps, cout, B, hw).transpose(0, 2, 1, 3)
    return out.reshape(n, cout, hs, ws)


# ----------------------------- reference (JAX) ----------------------------- #
def bilinear_upsample2x_align_corners(x):          # NHWC
    N, H, W, C = x.shape
    Ho, Wo = 2 * H, 2 * W
    ys = jnp.arange(Ho, dtype=jnp.float32) * ((H - 1) / (Ho - 1))
    xs = jnp.arange(Wo, dtype=jnp.float32) * ((W - 1) / (Wo - 1))
    y0 = jnp.floor(ys).astype(jnp.int32)
    y1 = jnp.minimum(y0 + 1, H - 1)
    wy = (ys - y0.astype(jnp.float32))[None, :, None, None]
    x0 = jnp.floor(xs).astype(jnp.int32)
    x1 = jnp.minimum(x0 + 1, W - 1)
    wx = (xs - x0.astype(jnp.float32))[None, None, :, None]
    r0 = x[:, y0, :, :]
    r1 = x[:, y1, :, :]
    top = r0[:, :, x0, :] * (1.0 - wx) + r0[:, :, x1, :] * wx
    bot = r1[:, :, x0, :] * (1.0 - wx) + r1[:, :, x1, :] * wx
    return top * (1.0 - wy) + bot * wy


def _ref_conv_bn_relu(x_nhwc, w_hwio, scale, shift):
    y = lax.conv_general_dilated(
        x_nhwc, w_hwio, window_strides=(1, 1), padding="SAME",
        dimension_numbers=("NHWC", "HWIO", "NHWC"),
        precision=lax.Precision.HIGHEST)
    return jnp.maximum(y * scale[None, None, None, :] + shift[None, None, None, :], 0.0)


def up_forward_ref(x_nchw, shortcut_nchw, params):
    x = jnp.transpose(x_nchw, (0, 2, 3, 1))
    sc = jnp.transpose(shortcut_nchw, (0, 2, 3, 1))
    up = bilinear_upsample2x_align_corners(x)
    diff_y = sc.shape[1] - up.shape[1]
    diff_x = sc.shape[2] - up.shape[2]
    up = jnp.pad(up, ((0, 0),
                      (diff_y // 2, diff_y - diff_y // 2),
                      (diff_x // 2, diff_x - diff_x // 2),
                      (0, 0)))
    cat = jnp.concatenate([sc, up], axis=-1)       # torch.cat((shortcut, up), dim=1)
    h = _ref_conv_bn_relu(cat, params["w1"], params["scale1"], params["shift1"])
    h = _ref_conv_bn_relu(h, params["w2"], params["scale2"], params["shift2"])
    return jnp.transpose(h, (0, 3, 1, 2))


# -------------------------------- main ------------------------------------ #
if __name__ == "__main__":
    key = jax.random.PRNGKey(0)
    k_x, k_sc, k_w1, k_w2 = jax.random.split(key, 4)

    # Up(in_channels=8, out_channels=4): x has 4 channels, shortcut has 4.
    N, Cx, Hx, Wx = 2, 4, 8, 8
    Cs, Hs, Ws = 4, 16, 16
    Cin, Cout = Cx + Cs, 4

    x = jax.random.normal(k_x, (N, Cx, Hx, Wx), jnp.float32)
    x_shortcut = jax.random.normal(k_sc, (N, Cs, Hs, Ws), jnp.float32)

    params = {
        "w1": 0.1 * jax.random.normal(k_w1, (3, 3, Cin, Cout), jnp.float32),
        "w2": 0.1 * jax.random.normal(k_w2, (3, 3, Cout, Cout), jnp.float32),
    }
    # BatchNorm2d default init: gamma=1, beta=0, running_mean=0, running_var=1.
    for i, c in ((1, Cout), (2, Cout)):
        scale, shift = fold_bn(jnp.ones((c,)), jnp.zeros((c,)),
                               jnp.zeros((c,)), jnp.ones((c,)))
        params[f"scale{i}"] = scale
        params[f"shift{i}"] = shift

    out = jax.block_until_ready(up_forward(x, x_shortcut, params))
    ref = jax.block_until_ready(up_forward_ref(x, x_shortcut, params))

    assert out.shape == (N, Cout, Hs, Ws), out.shape
    # Tolerance covers bf16 MXU operands (inputs/weights/im2col; ~2e-3 relative
    # per operand accumulated over two 3x3 convs -> ~1e-2 absolute worst case)
    # against the f32 HIGHEST-precision reference; structural bugs (wrong tap /
    # layout / alignment) would produce O(0.1-1) errors.
    np.testing.assert_allclose(np.asarray(out), np.asarray(ref),
                               rtol=3e-2, atol=3e-2)
    print("KERNEL_OK")
</pallas_src>

<mosaic_0001>
module attributes {stable_mosaic.version = 11 : i64} {
  func.func @kernel(%arg0: i32, %arg1: memref<1x8x384xbf16, #tpu.memory_space<vmem>>, %arg2: memref<384x384xbf16, #tpu.memory_space<vmem>>, %arg3: memref<384x384xf32, #tpu.memory_space<vmem>>, %arg4: memref<384x256xf32, #tpu.memory_space<vmem>>, %arg5: memref<8x72xbf16, #tpu.memory_space<vmem>>, %arg6: memref<8x384xf32, #tpu.memory_space<vmem>>, %arg7: memref<4x72xbf16, #tpu.memory_space<vmem>>, %arg8: memref<4x1xf32, #tpu.memory_space<vmem>>, %arg9: memref<1x4x256xf32, #tpu.memory_space<vmem>>, %arg10: memref<72x384xf32, #tpu.memory_space<vmem>>) attributes {dimension_semantics = [#tpu.dimension_semantics<parallel>], iteration_bounds = array<i64: 2>, scalar_prefetch = 0 : i64, scratch_operands = 1 : i64, tpu.core_type = #tpu.core_type<tc>, window_params = [{transform_indices = @transform_0, window_bounds = array<i64: 1, 8, 384>}, {pipeline_mode = #tpu.pipeline_mode<synchronous>, transform_indices = @transform_1, window_bounds = array<i64: 384, 384>}, {pipeline_mode = #tpu.pipeline_mode<synchronous>, transform_indices = @transform_2, window_bounds = array<i64: 384, 384>}, {pipeline_mode = #tpu.pipeline_mode<synchronous>, transform_indices = @transform_3, window_bounds = array<i64: 384, 256>}, {pipeline_mode = #tpu.pipeline_mode<synchronous>, transform_indices = @transform_4, window_bounds = array<i64: 8, 72>}, {pipeline_mode = #tpu.pipeline_mode<synchronous>, transform_indices = @transform_5, window_bounds = array<i64: 8, 384>}, {pipeline_mode = #tpu.pipeline_mode<synchronous>, transform_indices = @transform_6, window_bounds = array<i64: 4, 72>}, {pipeline_mode = #tpu.pipeline_mode<synchronous>, transform_indices = @transform_7, window_bounds = array<i64: 4, 1>}, {transform_indices = @transform_8, window_bounds = array<i64: 1, 4, 256>}]} {
    %c0 = arith.constant 0 : index
    %c0_0 = arith.constant 0 : index
    %c0_1 = arith.constant 0 : index
    %0 = vector.load %arg1[%c0, %c0_0, %c0_1] : memref<1x8x384xbf16, #tpu.memory_space<vmem>>, vector<1x8x384xbf16>
    %1 = vector.shape_cast %0 : vector<1x8x384xbf16> to vector<8x384xbf16>
    %c0_2 = arith.constant 0 : index
    %c0_3 = arith.constant 0 : index
    %2 = vector.load %arg2[%c0_2, %c0_3] : memref<384x384xbf16, #tpu.memory_space<vmem>>, vector<384x384xbf16>
    %cst = arith.constant dense<0.000000e+00> : vector<8x384xf32>
    %3 = tpu.matmul %1, %2, %cst {dimension_numbers = #tpu.dot_dimension_numbers<[1], [0], [0], [1], [0, 0, 1, 1], [], []>} : vector<8x384xbf16>, vector<384x384xbf16>, vector<8x384xf32> -> vector<8x384xf32>
    %c0_4 = arith.constant 0 : index
    %c0_5 = arith.constant 0 : index
    %4 = vector.load %arg10[%c0_4, %c0_5] : memref<72x384xf32, #tpu.memory_space<vmem>>, vector<8x384xf32>
    tpu.vector_store %arg10[%c0_4, %c0_5], %3 {strides = array<i32>} : memref<72x384xf32, #tpu.memory_space<vmem>>, vector<8x384xf32>,
    %c383_i32 = arith.constant 383 : i32
    %5 = tpu.dynamic_rotate %3 by %c383_i32 dim 1 : vector<8x384xf32>, i32 -> vector<8x384xf32>
    %c8 = arith.constant 8 : index
    %c0_6 = arith.constant 0 : index
    %6 = vector.load %arg10[%c8, %c0_6] : memref<72x384xf32, #tpu.memory_space<vmem>>, vector<8x384xf32>
    tpu.vector_store %arg10[%c8, %c0_6], %5 {strides = array<i32>} : memref<72x384xf32, #tpu.memory_space<vmem>>, vector<8x384xf32>,
    %c382_i32 = arith.constant 382 : i32
    %7 = tpu.dynamic_rotate %3 by %c382_i32 dim 1 : vector<8x384xf32>, i32 -> vector<8x384xf32>
    %c16 = arith.constant 16 : index
    %c0_7 = arith.constant 0 : index
    %8 = vector.load %arg10[%c16, %c0_7] : memref<72x384xf32, #tpu.memory_space<vmem>>, vector<8x384xf32>
    tpu.vector_store %arg10[%c16, %c0_7], %7 {strides = array<i32>} : memref<72x384xf32, #tpu.memory_space<vmem>>, vector<8x384xf32>,
    %c366_i32 = arith.constant 366 : i32
    %9 = tpu.dynamic_rotate %3 by %c366_i32 dim 1 : vector<8x384xf32>, i32 -> vector<8x384xf32>
    %c24 = arith.constant 24 : index
    %c0_8 = arith.constant 0 : index
    %10 = vector.load %arg10[%c24, %c0_8] : memref<72x384xf32, #tpu.memory_space<vmem>>, vector<8x384xf32>
    tpu.vector_store %arg10[%c24, %c0_8], %9 {strides = array<i32>} : memref<72x384xf32, #tpu.memory_space<vmem>>, vector<8x384xf32>,
    %c365_i32 = arith.constant 365 : i32
    %11 = tpu.dynamic_rotate %3 by %c365_i32 dim 1 : vector<8x384xf32>, i32 -> vector<8x384xf32>
    %c32 = arith.constant 32 : index
    %c0_9 = arith.constant 0 : index
    %12 = vector.load %arg10[%c32, %c0_9] : memref<72x384xf32, #tpu.memory_space<vmem>>, vector<8x384xf32>
    tpu.vector_store %arg10[%c32, %c0_9], %11 {strides = array<i32>} : memref<72x384xf32, #tpu.memory_space<vmem>>, vector<8x384xf32>,
    %c364_i32 = arith.constant 364 : i32
    %13 = tpu.dynamic_rotate %3 by %c364_i32 dim 1 : vector<8x384xf32>, i32 -> vector<8x384xf32>
    %c40 = arith.constant 40 : index
    %c0_10 = arith.constant 0 : index
    %14 = vector.load %arg10[%c40, %c0_10] : memref<72x384xf32, #tpu.memory_space<vmem>>, vector<8x384xf32>
    tpu.vector_store %arg10[%c40, %c0_10], %13 {strides = array<i32>} : memref<72x384xf32, #tpu.memory_space<vmem>>, vector<8x384xf32>,
    %c348_i32 = arith.constant 348 : i32
    %15 = tpu.dynamic_rotate %3 by %c348_i32 dim 1 : vector<8x384xf32>, i32 -> vector<8x384xf32>
    %c48 = arith.constant 48 : index
    %c0_11 = arith.constant 0 : index
    %16 = vector.load %arg10[%c48, %c0_11] : memref<72x384xf32, #tpu.memory_space<vmem>>, vector<8x384xf32>
    tpu.vector_store %arg10[%c48, %c0_11], %15 {strides = array<i32>} : memref<72x384xf32, #tpu.memory_space<vmem>>, vector<8x384xf32>,
    %c347_i32 = arith.constant 347 : i32
    %17 = tpu.dynamic_rotate %3 by %c347_i32 dim 1 : vector<8x384xf32>, i32 -> vector<8x384xf32>
    %c56 = arith.constant 56 : index
    %c0_12 = arith.constant 0 : index
    %18 = vector.load %arg10[%c56, %c0_12] : memref<72x384xf32, #tpu.memory_space<vmem>>, vector<8x384xf32>
    tpu.vector_store %arg10[%c56, %c0_12], %17 {strides = array<i32>} : memref<72x384xf32, #tpu.memory_space<vmem>>, vector<8x384xf32>,
    %c346_i32 = arith.constant 346 : i32
    %19 = tpu.dynamic_rotate %3 by %c346_i32 dim 1 : vector<8x384xf32>, i32 -> vector<8x384xf32>
    %c64 = arith.constant 64 : index
    %c0_13 = arith.constant 0 : index
    %20 = vector.load %arg10[%c64, %c0_13] : memref<72x384xf32, #tpu.memory_space<vmem>>, vector<8x384xf32>
    tpu.vector_store %arg10[%c64, %c0_13], %19 {strides = array<i32>} : memref<72x384xf32, #tpu.memory_space<vmem>>, vector<8x384xf32>,
    %c0_14 = arith.constant 0 : index
    %c0_15 = arith.constant 0 : index
    %21 = vector.load %arg5[%c0_14, %c0_15] : memref<8x72xbf16, #tpu.memory_space<vmem>>, vector<8x72xbf16>
    %c0_16 = arith.constant 0 : index
    %c0_17 = arith.constant 0 : index
    %22 = vector.load %arg10[%c0_16, %c0_17] : memref<72x384xf32, #tpu.memory_space<vmem>>, vector<72x384xf32>
    %23 = arith.truncf %22 : vector<72x384xf32> to vector<72x384xbf16>
    %cst_18 = arith.constant dense<0.000000e+00> : vector<8x384xf32>
    %24 = tpu.matmul %21, %23, %cst_18 {dimension_numbers = #tpu.dot_dimension_numbers<[1], [0], [0], [1], [0, 0, 1, 1], [], []>} : vector<8x72xbf16>, vector<72x384xbf16>, vector<8x384xf32> -> vector<8x384xf32>
    %c0_19 = arith.constant 0 : index
    %c0_20 = arith.constant 0 : index
    %25 = vector.load %arg3[%c0_19, %c0_20] : memref<384x384xf32, #tpu.memory_space<vmem>>, vector<384x384xf32>
    %cst_21 = arith.constant dense<0.000000e+00> : vector<8x384xf32>
    %26 = tpu.matmul %24, %25, %cst_21 {dimension_numbers = #tpu.dot_dimension_numbers<[1], [0], [0], [1], [0, 0, 1, 1], [], []>} : vector<8x384xf32>, vector<384x384xf32>, vector<8x384xf32> -> vector<8x384xf32>
    %c0_22 = arith.constant 0 : index
    %c0_23 = arith.constant 0 : index
    %27 = vector.load %arg6[%c0_22, %c0_23] : memref<8x384xf32, #tpu.memory_space<vmem>>, vector<8x384xf32>
    %28 = arith.addf %26, %27 : vector<8x384xf32>
    %cst_24 = arith.constant 0.000000e+00 : f32
    %29 = vector.broadcast %cst_24 : f32 to vector<8x384xf32>
    %30 = arith.maximumf %28, %29 : vector<8x384xf32>
    %c0_25 = arith.constant 0 : index
    %c0_26 = arith.constant 0 : index
    %31 = vector.load %arg10[%c0_25, %c0_26] : memref<72x384xf32, #tpu.memory_space<vmem>>, vector<8x384xf32>
    tpu.vector_store %arg10[%c0_25, %c0_26], %30 {strides = array<i32>} : memref<72x384xf32, #tpu.memory_space<vmem>>, vector<8x384xf32>,
    %c383_i32_27 = arith.constant 383 : i32
    %32 = tpu.dynamic_rotate %30 by %c383_i32_27 dim 1 : vector<8x384xf32>, i32 -> vector<8x384xf32>
    %c8_28 = arith.constant 8 : index
    %c0_29 = arith.constant 0 : index
    %33 = vector.load %arg10[%c8_28, %c0_29] : memref<72x384xf32, #tpu.memory_space<vmem>>, vector<8x384xf32>
    tpu.vector_store %arg10[%c8_28, %c0_29], %32 {strides = array<i32>} : memref<72x384xf32, #tpu.memory_space<vmem>>, vector<8x384xf32>,
    %c382_i32_30 = arith.constant 382 : i32
    %34 = tpu.dynamic_rotate %30 by %c382_i32_30 dim 1 : vector<8x384xf32>, i32 -> vector<8x384xf32>
    %c16_31 = arith.constant 16 : index
    %c0_32 = arith.constant 0 : index
    %35 = vector.load %arg10[%c16_31, %c0_32] : memref<72x384xf32, #tpu.memory_space<vmem>>, vector<8x384xf32>
    tpu.vector_store %arg10[%c16_31, %c0_32], %34 {strides = array<i32>} : memref<72x384xf32, #tpu.memory_space<vmem>>, vector<8x384xf32>,
    %c366_i32_33 = arith.constant 366 : i32
    %36 = tpu.dynamic_rotate %30 by %c366_i32_33 dim 1 : vector<8x384xf32>, i32 -> vector<8x384xf32>
    %c24_34 = arith.constant 24 : index
    %c0_35 = arith.constant 0 : index
    %37 = vector.load %arg10[%c24_34, %c0_35] : memref<72x384xf32, #tpu.memory_space<vmem>>, vector<8x384xf32>
    tpu.vector_store %arg10[%c24_34, %c0_35], %36 {strides = array<i32>} : memref<72x384xf32, #tpu.memory_space<vmem>>, vector<8x384xf32>,
    %c365_i32_36 = arith.constant 365 : i32
    %38 = tpu.dynamic_rotate %30 by %c365_i32_36 dim 1 : vector<8x384xf32>, i32 -> vector<8x384xf32>
    %c32_37 = arith.constant 32 : index
    %c0_38 = arith.constant 0 : index
    %39 = vector.load %arg10[%c32_37, %c0_38] : memref<72x384xf32, #tpu.memory_space<vmem>>, vector<8x384xf32>
    tpu.vector_store %arg10[%c32_37, %c0_38], %38 {strides = array<i32>} : memref<72x384xf32, #tpu.memory_space<vmem>>, vector<8x384xf32>,
    %c364_i32_39 = arith.constant 364 : i32
    %40 = tpu.dynamic_rotate %30 by %c364_i32_39 dim 1 : vector<8x384xf32>, i32 -> vector<8x384xf32>
    %c40_40 = arith.constant 40 : index
    %c0_41 = arith.constant 0 : index
    %41 = vector.load %arg10[%c40_40, %c0_41] : memref<72x384xf32, #tpu.memory_space<vmem>>, vector<8x384xf32>
    tpu.vector_store %arg10[%c40_40, %c0_41], %40 {strides = array<i32>} : memref<72x384xf32, #tpu.memory_space<vmem>>, vector<8x384xf32>,
    %c348_i32_42 = arith.constant 348 : i32
    %42 = tpu.dynamic_rotate %30 by %c348_i32_42 dim 1 : vector<8x384xf32>, i32 -> vector<8x384xf32>
    %c48_43 = arith.constant 48 : index
    %c0_44 = arith.constant 0 : index
    %43 = vector.load %arg10[%c48_43, %c0_44] : memref<72x384xf32, #tpu.memory_space<vmem>>, vector<8x384xf32>
    tpu.vector_store %arg10[%c48_43, %c0_44], %42 {strides = array<i32>} : memref<72x384xf32, #tpu.memory_space<vmem>>, vector<8x384xf32>,
    %c347_i32_45 = arith.constant 347 : i32
    %44 = tpu.dynamic_rotate %30 by %c347_i32_45 dim 1 : vector<8x384xf32>, i32 -> vector<8x384xf32>
    %c56_46 = arith.constant 56 : index
    %c0_47 = arith.constant 0 : index
    %45 = vector.load %arg10[%c56_46, %c0_47] : memref<72x384xf32, #tpu.memory_space<vmem>>, vector<8x384xf32>
    tpu.vector_store %arg10[%c56_46, %c0_47], %44 {strides = array<i32>} : memref<72x384xf32, #tpu.memory_space<vmem>>, vector<8x384xf32>,
    %c346_i32_48 = arith.constant 346 : i32
    %46 = tpu.dynamic_rotate %30 by %c346_i32_48 dim 1 : vector<8x384xf32>, i32 -> vector<8x384xf32>
    %c64_49 = arith.constant 64 : index
    %c0_50 = arith.constant 0 : index
    %47 = vector.load %arg10[%c64_49, %c0_50] : memref<72x384xf32, #tpu.memory_space<vmem>>, vector<8x384xf32>
    tpu.vector_store %arg10[%c64_49, %c0_50], %46 {strides = array<i32>} : memref<72x384xf32, #tpu.memory_space<vmem>>, vector<8x384xf32>,
    %c0_51 = arith.constant 0 : index
    %c0_52 = arith.constant 0 : index
    %48 = vector.load %arg7[%c0_51, %c0_52] : memref<4x72xbf16, #tpu.memory_space<vmem>>, vector<4x72xbf16>
    %c0_53 = arith.constant 0 : index
    %c0_54 = arith.constant 0 : index
    %49 = vector.load %arg10[%c0_53, %c0_54] : memref<72x384xf32, #tpu.memory_space<vmem>>, vector<72x384xf32>
    %50 = arith.truncf %49 : vector<72x384xf32> to vector<72x384xbf16>
    %cst_55 = arith.constant dense<0.000000e+00> : vector<4x384xf32>
    %51 = tpu.matmul %48, %50, %cst_55 {dimension_numbers = #tpu.dot_dimension_numbers<[1], [0], [0], [1], [0, 0, 1, 1], [], []>} : vector<4x72xbf16>, vector<72x384xbf16>, vector<4x384xf32> -> vector<4x384xf32>
    %c0_56 = arith.constant 0 : index
    %c0_57 = arith.constant 0 : index
    %52 = vector.load %arg4[%c0_56, %c0_57] : memref<384x256xf32, #tpu.memory_space<vmem>>, vector<384x256xf32>
    %cst_58 = arith.constant dense<0.000000e+00> : vector<4x256xf32>
    %53 = tpu.matmul %51, %52, %cst_58 {dimension_numbers = #tpu.dot_dimension_numbers<[1], [0], [0], [1], [0, 0, 1, 1], [], []>} : vector<4x384xf32>, vector<384x256xf32>, vector<4x256xf32> -> vector<4x256xf32>
    %c0_59 = arith.constant 0 : index
    %c0_60 = arith.constant 0 : index
    %54 = vector.load %arg8[%c0_59, %c0_60] : memref<4x1xf32, #tpu.memory_space<vmem>>, vector<4x1xf32>
    %55 = vector.broadcast %54 : vector<4x1xf32> to vector<4x256xf32>
    %56 = arith.addf %53, %55 : vector<4x256xf32>
    %cst_61 = arith.constant 0.000000e+00 : f32
    %57 = vector.broadcast %cst_61 : f32 to vector<4x256xf32>
    %58 = arith.maximumf %56, %57 : vector<4x256xf32>
    %c0_62 = arith.constant 0 : index
    %c0_63 = arith.constant 0 : index
    %c0_64 = arith.constant 0 : index
    %59 = vector.load %arg9[%c0_62, %c0_63, %c0_64] : memref<1x4x256xf32, #tpu.memory_space<vmem>>, vector<1x4x256xf32>
    %60 = vector.shape_cast %59 : vector<1x4x256xf32> to vector<4x256xf32>
    %61 = vector.shape_cast %58 : vector<4x256xf32> to vector<1x4x256xf32>
    tpu.vector_store %arg9[%c0_62, %c0_63, %c0_64], %61 {strides = array<i32>} : memref<1x4x256xf32, #tpu.memory_space<vmem>>, vector<1x4x256xf32>,
    return
  }
  func.func @transform_0(%arg0: i32) -> (i32, i32, i32) {
    %c0_i32 = arith.constant 0 : i32
    %c0_i32_0 = arith.constant 0 : i32
    %c0_i32_1 = arith.constant 0 : i32
    return %arg0, %c0_i32, %c0_i32_0 : i32, i32, i32
  }
  func.func @transform_1(%arg0: i32) -> (i32, i32) {
    %c0_i32 = arith.constant 0 : i32
    %c0_i32_0 = arith.constant 0 : i32
    %c0_i32_1 = arith.constant 0 : i32
    return %c0_i32, %c0_i32_0 : i32, i32
  }
  func.func @transform_2(%arg0: i32) -> (i32, i32) {
    %c0_i32 = arith.constant 0 : i32
    %c0_i32_0 = arith.constant 0 : i32
    %c0_i32_1 = arith.constant 0 : i32
    return %c0_i32, %c0_i32_0 : i32, i32
  }
  func.func @transform_3(%arg0: i32) -> (i32, i32) {
    %c0_i32 = arith.constant 0 : i32
    %c0_i32_0 = arith.constant 0 : i32
    %c0_i32_1 = arith.constant 0 : i32
    return %c0_i32, %c0_i32_0 : i32, i32
  }
  func.func @transform_4(%arg0: i32) -> (i32, i32) {
    %c0_i32 = arith.constant 0 : i32
    %c0_i32_0 = arith.constant 0 : i32
    %c0_i32_1 = arith.constant 0 : i32
    return %c0_i32, %c0_i32_0 : i32, i32
  }
  func.func @transform_5(%arg0: i32) -> (i32, i32) {
    %c0_i32 = arith.constant 0 : i32
    %c0_i32_0 = arith.constant 0 : i32
    %c0_i32_1 = arith.constant 0 : i32
    return %c0_i32, %c0_i32_0 : i32, i32
  }
  func.func @transform_6(%arg0: i32) -> (i32, i32) {
    %c0_i32 = arith.constant 0 : i32
    %c0_i32_0 = arith.constant 0 : i32
    %c0_i32_1 = arith.constant 0 : i32
    return %c0_i32, %c0_i32_0 : i32, i32
  }
  func.func @transform_7(%arg0: i32) -> (i32, i32) {
    %c0_i32 = arith.constant 0 : i32
    %c0_i32_0 = arith.constant 0 : i32
    %c0_i32_1 = arith.constant 0 : i32
    return %c0_i32, %c0_i32_0 : i32, i32
  }
  func.func @transform_8(%arg0: i32) -> (i32, i32, i32) {
    %c0_i32 = arith.constant 0 : i32
    %c0_i32_0 = arith.constant 0 : i32
    %c0_i32_1 = arith.constant 0 : i32
    return %arg0, %c0_i32, %c0_i32_0 : i32, i32, i32
  }
}

</mosaic_0001>

<bundles_post_ra>
// kernel: up_forward.1
= control target key start
LH: loop header
LB: loop body
LE: loop exit
PB: predicated region body
PF: predicated region fallthrough
CT: control target
= control target key end

     0   :  { %s2976_s27 = smov 0   ;;  %s4277_s0 = inlined_call_operand.vmem [shape: bf16[2,8,384], index: 0, kind: input, shape index: {}]   ;;  %s4278_s1 = inlined_call_operand.vmem [shape: bf16[384,384], index: 1, kind: input, shape index: {}]   ;;  %s4279_s2 = inlined_call_operand.vmem [shape: f32[384,384], index: 2, kind: input, shape index: {}]   ;;  %s4280_s3 = inlined_call_operand.vmem [shape: f32[384,256], index: 3, kind: input, shape index: {}]   ;;  %s4281_s4 = inlined_call_operand.vmem [shape: bf16[8,72], index: 4, kind: input, shape index: {}]   ;;  %s4282_s5 = inlined_call_operand.vmem [shape: f32[8,384], index: 5, kind: input, shape index: {}]   ;;  %s4283_s6 = inlined_call_operand.vmem [shape: bf16[4,72], index: 6, kind: input, shape index: {}]   ;;  %s4284_s7 = inlined_call_operand.vmem [shape: f32[4,1], index: 7, kind: input, shape index: {}]   ;;  %s4285_s8 = inlined_call_operand.vmem [shape: f32[2,4,256], index: 8, kind: output, shape index: {}]  }
   0x1 LB: > { %s2182_s28 = sadd.s32 4294967295, %s2917_s27   ;;  %p2186_p0 = scmp.ge.s32.totalorder %s2917_s27, 1  ;;  %s2917_s27 = sphi %s2976_s27, %s18_s27  }
   0x2   : > { %p262_p1 = scmp.lt.s32.totalorder %s2917_s27, 3 }
   0x4   : > { %p263_p2 = pnand %p2186_p0, %p262_p1 }
   0x5   : > { %v2812_v0 = vld [vmem:[%s4278_s1 + $0x4] ss:$12 sps:$4 sm:$0xff] (!%p263_p2)   ;;  %v2919_v2 = vmov (!%p263_p2), 0   ;;  %v2816_v3 = vld [vmem:[%s4278_s1] ss:$12 sps:$4 sm:$0xff] (!%p263_p2)   ;;  %p296_p3 = scmp.lt.s32.totalorder (!%p263_p2), %s2182_s28, 1 }
   0x6   : > { %266 = sbr.rel (%p263_p2) target bundleno = 1539 (0x603), region = 52  ;;  %v2814_v1 = vld [vmem:[%s4278_s1 + $0x184] ss:$12 sps:$4 sm:$0xff] (!%p263_p2)   ;;  %873 = vmatprep.mubr.bf16.mxu1 (!%p263_p2), %v2919_v2  ;;  %2811 = vset.pattern.permute.xlu0 (!%p263_p2), %v2919_v2  ;;  %v2817_v4 = vld [vmem:[%s4278_s1 + $0x180] ss:$12 sps:$4 sm:$0xff] (!%p263_p2)   ;;  %vm2921_vm0 = vmmov (!%p263_p2), 0  }
   0x7   : > { %800 = vmatprep.subr.bf16.mxu0 (!%p263_p2), %v2812_v0  ;;  %841 = vmatprep.subr.bf16.mxu1 (!%p263_p2), %v2814_v1  ;;  %v2818_v5 = vld [vmem:[%s4278_s1 + $0x1c] ss:$12 sps:$4 sm:$0xff] (!%p263_p2)   ;;  %v2822_v7 = vld [vmem:[%s4278_s1 + $0x18] ss:$12 sps:$4 sm:$0xff] (!%p263_p2)   ;;  %v2824_v9 = vld [vmem:[%s4278_s1 + $0x34] ss:$12 sps:$4 sm:$0xff] (!%p263_p2)  }
   0x8   : > { %801 = vmatpush1.bf16.msra.mxu0 (!%p263_p2), %v2816_v3  ;;  %842 = vmatpush1.bf16.msra.mxu1 (!%p263_p2), %v2817_v4  ;;  %v2820_v6 = vld [vmem:[%s4278_s1 + $0x19c] ss:$12 sps:$4 sm:$0xff] (!%p263_p2)   ;;  %v2823_v8 = vld [vmem:[%s4278_s1 + $0x198] ss:$12 sps:$4 sm:$0xff] (!%p263_p2)   ;;  %v2826_v10 = vld [vmem:[%s4278_s1 + $0x1b4] ss:$12 sps:$4 sm:$0xff] (!%p263_p2)  }
   0x9   : > { %802 = vmatprep.subr.bf16.mxu0 (!%p263_p2), %v2818_v5  ;;  %843 = vmatprep.subr.bf16.mxu1 (!%p263_p2), %v2820_v6  ;;  %v2828_v11 = vld [vmem:[%s4278_s1 + $0x30] ss:$12 sps:$4 sm:$0xff] (!%p263_p2)   ;;  %v2830_v13 = vld [vmem:[%s4278_s1 + $0x4c] ss:$12 sps:$4 sm:$0xff] (!%p263_p2)   ;;  %v2834_v15 = vld [vmem:[%s4278_s1 + $0x48] ss:$12 sps:$4 sm:$0xff] (!%p263_p2)  }
   0xa   : > { %v2829_v12 = vld [vmem:[%s4278_s1 + $0x1b0] ss:$12 sps:$4 sm:$0xff] (!%p263_p2)   ;;  %v2832_v14 = vld [vmem:[%s4278_s1 + $0x1cc] ss:$12 sps:$4 sm:$0xff] (!%p263_p2)   ;;  %v2835_v16 = vld [vmem:[%s4278_s1 + $0x1c8] ss:$12 sps:$4 sm:$0xff] (!%p263_p2)  }
   0xb   : > { %v2836_v17 = vld [vmem:[%s4278_s1 + $0x64] ss:$12 sps:$4 sm:$0xff] (!%p263_p2)   ;;  %v2840_v19 = vld [vmem:[%s4278_s1 + $0x60] ss:$12 sps:$4 sm:$0xff] (!%p263_p2)   ;;  %v2842_v21 = vld [vmem:[%s4278_s1 + $0x7c] ss:$12 sps:$4 sm:$0xff] (!%p263_p2)  }
   0xc   : > { %803 = vmatpush1.bf16.msra.mxu0 (!%p263_p2), %v2822_v7  ;;  %844 = vmatpush1.bf16.msra.mxu1 (!%p263_p2), %v2823_v8  ;;  %v2838_v18 = vld [vmem:[%s4278_s1 + $0x1e4] ss:$12 sps:$4 sm:$0xff] (!%p263_p2)   ;;  %v2841_v20 = vld [vmem:[%s4278_s1 + $0x1e0] ss:$12 sps:$4 sm:$0xff] (!%p263_p2)   ;;  %v2844_v22 = vld [vmem:[%s4278_s1 + $0x1fc] ss:$12 sps:$4 sm:$0xff] (!%p263_p2)  }
   0xd   : > { %804 = vmatprep.subr.bf16.mxu0 %v2824_v9  ;;  %845 = vmatprep.subr.bf16.mxu1 %v2826_v10  ;;  %s4287_s28 = smov (!%p296_p3, %s2182_s28), 1  ;;  %v2846_v23 = vld [vmem:[%s4278_s1 + $0x78] ss:$12 sps:$4 sm:$0xff]   ;;  %v2848_v25 = vld [vmem:[%s4278_s1 + $0x94] ss:$12 sps:$4 sm:$0xff]   ;;  %v2920_v7 = vmov 0.0  }
   0xe   : > { %s2710_s11 = smul.u32 12, %s4287_s28  ;;  %v2847_v24 = vld [vmem:[%s4278_s1 + $0x1f8] ss:$12 sps:$4 sm:$0xff]   ;;  %v2850_v26 = vld [vmem:[%s4278_s1 + $0x214] ss:$12 sps:$4 sm:$0xff]   ;;  %s2922_s17 = smov 110  }
   0xf   : > { %v2852_v27 = vld [vmem:[%s4278_s1 + $0x90] ss:$12 sps:$4 sm:$0xff]   ;;  %v2854_v29 = vld [vmem:[%s4278_s1 + $0xac] ss:$12 sps:$4 sm:$0xff]   ;;  %v2858_v31 = vld [vmem:[%s4278_s1 + $0xa8] ss:$12 sps:$4 sm:$0xff]  }
  0x10   : > { %805 = vmatpush1.bf16.msra.mxu0 %v2828_v11  ;;  %846 = vmatpush1.bf16.msra.mxu1 %v2829_v12  ;;  %s3074_s22 = scalar_lea.vmem %s4277_s0, %s2710_s11  ;;  %v2853_v28 = vld [vmem:[%s4278_s1 + $0x210] ss:$12 sps:$4 sm:$0xff]   ;;  %v2856_v30 = vld [vmem:[%s4278_s1 + $0x22c] ss:$12 sps:$4 sm:$0xff]   ;;  %v2859_v32 = vld [vmem:[%s4278_s1 + $0x228] ss:$12 sps:$4 sm:$0xff]  }
  0x11   : > { %806 = vmatprep.subr.bf16.mxu0 %v2830_v13  ;;  %847 = vmatprep.subr.bf16.mxu1 %v2832_v14  ;;  %v2860_v33 = vld [vmem:[%s4278_s1 + $0xc4] ss:$12 sps:$4 sm:$0xff]   ;;  %v2863_v34 = vld [vmem:[%s4278_s1 + $0xc8] ss:$12 sps:$4 sm:$0xff]   ;;  %v2864_v36 = vld [vmem:[%s4278_s1 + $0xc0] ss:$12 sps:$4 sm:$0xff]  }
  0x12   : > { %v3101_v35 = vld [vmem:[%s3074_s22 + $0x8] ss:$0 sps:$4 sm:$0xff]   ;;  %v2868_v39 = vld [vmem:[%s4278_s1 + $0xe0] ss:$12 sps:$4 sm:$0xff]   ;;  %v2869_v40 = vld [vmem:[%s4278_s1 + $0xd8] ss:$12 sps:$4 sm:$0xff]  }
  0x13   : > { %v2865_v37 = vld [vmem:[%s4278_s1 + $0x8] ss:$12 sps:$4 sm:$0xff]   ;;  %v2870_v41 = vld [vmem:[%s4278_s1 + $0x20] ss:$12 sps:$4 sm:$0xff]   ;;  %v2873_v43 = vld [vmem:[%s4278_s1 + $0xf8] ss:$12 sps:$4 sm:$0xff]  }
  0x14   : > { %807 = vmatpush1.bf16.msra.mxu0 %v2834_v15  ;;  %848 = vmatpush1.bf16.msra.mxu1 %v2835_v16  ;;  %v2866_v38 = vld [vmem:[%s4278_s1 + $0xdc] ss:$12 sps:$4 sm:$0xff]   ;;  %v2871_v42 = vld [vmem:[%s4278_s1 + $0xf4] ss:$12 sps:$4 sm:$0xff]   ;;  %v2875_v45 = vld [vmem:[%s4278_s1 + $0x38] ss:$12 sps:$4 sm:$0xff]  }
  0x15   : > { %808 = vmatprep.subr.bf16.mxu0 %v2836_v17  ;;  %849 = vmatprep.subr.bf16.mxu1 %v2838_v18  ;;  %v2874_v44 = vld [vmem:[%s4278_s1 + $0xf0] ss:$12 sps:$4 sm:$0xff]   ;;  %v2876_v46 = vld [vmem:[%s4278_s1 + $0x10c] ss:$12 sps:$4 sm:$0xff]   ;;  %v2879_v48 = vld [vmem:[%s4278_s1 + $0x108] ss:$12 sps:$4 sm:$0xff]  }
  0x16   : > { %v2878_v47 = vld [vmem:[%s4278_s1 + $0x110] ss:$12 sps:$4 sm:$0xff]   ;;  %v2883_v51 = vld [vmem:[%s4278_s1 + $0x128] ss:$12 sps:$4 sm:$0xff]   ;;  %v2884_v52 = vld [vmem:[%s4278_s1 + $0x120] ss:$12 sps:$4 sm:$0xff]  }
  0x17   : > { %v2880_v49 = vld [vmem:[%s4278_s1 + $0x50] ss:$12 sps:$4 sm:$0xff]   ;;  %v2885_v53 = vld [vmem:[%s4278_s1 + $0x68] ss:$12 sps:$4 sm:$0xff]   ;;  %v307_v55 = vld [vmem:[%s3074_s22] sm:$0xff]  ;;  %s2923_s18 = smov 127  }
  0x18   : > { %809 = vmatpush1.bf16.msra.mxu0 %v2840_v19  ;;  %850 = vmatpush1.bf16.msra.mxu1 %v2841_v20  ;;  %v2881_v50 = vld [vmem:[%s4278_s1 + $0x124] ss:$12 sps:$4 sm:$0xff]   ;;  %v2886_v54 = vld [vmem:[%s4278_s1 + $0x13c] ss:$12 sps:$4 sm:$0xff]   ;;  %v2888_v56 = vld [vmem:[%s4278_s1 + $0x140] ss:$12 sps:$4 sm:$0xff]   ;;  %v2191_v57 = vcombine.high %v307_v55, %v307_v55  ;;  %v2190_v5 = vcombine.low %v307_v55, %v307_v55 }
  0x19   : > { %810 = vmatprep.subr.bf16.mxu0 %v2842_v21  ;;  %851 = vmatprep.subr.bf16.mxu1 %v2844_v22  ;;  %v2889_v58 = vld [vmem:[%s4278_s1 + $0x138] ss:$12 sps:$4 sm:$0xff]   ;;  %v2890_v59 = vld [vmem:[%s4278_s1 + $0x80] ss:$12 sps:$4 sm:$0xff]   ;;  %v2894_v62 = vld [vmem:[%s4278_s1 + $0x150] ss:$12 sps:$4 sm:$0xff]  }
  0x1a   : > { %832 = vmatprep.mubr.bf16.mxu0 %v2191_v57  ;;  %v2891_v60 = vld [vmem:[%s4278_s1 + $0x154] ss:$12 sps:$4 sm:$0xff]   ;;  %v2893_v61 = vld [vmem:[%s4278_s1 + $0x158] ss:$12 sps:$4 sm:$0xff]   ;;  %v2898_v1 = vld [vmem:[%s4278_s1 + $0x170] ss:$12 sps:$4 sm:$0xff]  }
  0x1b   : > { %v2895_v63 = vld [vmem:[%s4278_s1 + $0x98] ss:$12 sps:$4 sm:$0xff]   ;;  %v2899_v3 = vld [vmem:[%s4278_s1 + $0x168] ss:$12 sps:$4 sm:$0xff]   ;;  %v2900_v4 = vld [vmem:[%s4278_s1 + $0xb0] ss:$12 sps:$4 sm:$0xff]  }
  0x1c   : > { %811 = vmatpush1.bf16.msra.mxu0 %v2846_v23  ;;  %852 = vmatpush1.bf16.msra.mxu1 %v2847_v24  ;;  %v2896_v0 = vld [vmem:[%s4278_s1 + $0x16c] ss:$12 sps:$4 sm:$0xff]   ;;  %v2903_v6 = vld [vmem:[%s4278_s1 + $0x188] ss:$12 sps:$4 sm:$0xff]   ;;  %v2906_v10 = vld [vmem:[%s4278_s1 + $0x1d0] ss:$12 sps:$4 sm:$0xff]  }
  0x1d   : > { %812 = vmatprep.subr.bf16.mxu0 %v2848_v25  ;;  %853 = vmatprep.subr.bf16.mxu1 %v2850_v26  ;;  %v2904_v8 = vld [vmem:[%s4278_s1 + $0x1a0] ss:$12 sps:$4 sm:$0xff]   ;;  %v2905_v9 = vld [vmem:[%s4278_s1 + $0x1b8] ss:$12 sps:$4 sm:$0xff]   ;;  %v2907_v11 = vld [vmem:[%s4278_s1 + $0x1e8] ss:$12 sps:$4 sm:$0xff]  }
  0x1e   : > { %v2908_v12 = vld [vmem:[%s4278_s1 + $0x200] ss:$12 sps:$4 sm:$0xff]   ;;  %v2909_v13 = vld [vmem:[%s4278_s1 + $0x218] ss:$12 sps:$4 sm:$0xff]   ;;  %v2910_v14 = vld [vmem:[%s4278_s1 + $0x230] ss:$12 sps:$4 sm:$0xff]  }
  0x1f   : > { %s2924_s19 = smov 108   ;;  %s2925_s20 = smov 126   ;;  %v1231_v55 = vld [vmem:[%s4279_s2 + $0xb0] sm:$0xff]  ;;  %vm1118_vm9 = vcmask 1043456   ;;  %vm1114_vm10 = vcmask 588800  }
  0x20   : > { %813 = vmatpush1.bf16.msra.mxu0 %v2852_v27  ;;  %854 = vmatpush1.bf16.msra.mxu1 %v2853_v28  ;;  %s2926_s21 = smov 91   ;;  %s2927_s23 = smov 109  }
  0x21   : > { %814 = vmatprep.subr.bf16.mxu0 %v2854_v29  ;;  %855 = vmatprep.subr.bf16.mxu1 %v2856_v30  ;;  %s2928_s24 = smov 92   ;;  %s2929_s25 = smov 90  }
  0x22   : > { %s2273_s9 = sshll.u32 %s4287_s28, 3 }
  0x23   : > { %s305_s12 = scalar_lea.vmem %s4285_s8, %s2273_s9 }
  0x24   : > { %815 = vmatpush1.bf16.msra.mxu0 %v2858_v31  ;;  %856 = vmatpush1.bf16.msra.mxu1 %v2859_v32 }
  0x25   : > { %816 = vmatprep.subr.bf16.mxu0 %v2860_v33  ;;  %2274 = vmatprep.subr.bf16.mxu1 %v2863_v34 }
  0x27   : > { %874 = vmatmul.mubr.bf16.vlgmr.msra.gmra.mrb[0].mxu1 %v3101_v35 }
  0x28   : > { %817 = vmatpush1.bf16.msra.mxu0 %v2864_v36  ;;  %2275 = vmatpush3.bf16.msra.mxu1 %v2865_v37  ;;  %v1210_v37 = vld [vmem:[%s4279_s2 + $0x8] sm:$0xff] }
  0x29   : > { %818 = vmatprep.subr.bf16.mxu0 %v2866_v38  ;;  %2276 = vmatprep.subr.bf16.mxu1 %v2868_v39  ;;  %v1213_v38 = vld [vmem:[%s4279_s2 + $0x20] sm:$0xff] }
  0x2a   : > { %914 = vmatprep.mubr.bf16.mxu1 %v2191_v57  ;;  %v1209_v39 = vld [vmem:[%s4279_s2] sm:$0xff] }
  0x2c   : > { %819 = vmatpush1.bf16.msra.mxu0 %v2869_v40  ;;  %2277 = vmatpush3.bf16.msra.mxu1 %v2870_v41  ;;  %v2452_v40 = vpack.c.bf16 %v1213_v38, %v1210_v37  ;;  %v1212_v41 = vld [vmem:[%s4279_s2 + $0x18] sm:$0xff]  ;;  %v1270_v37 = vld [vmem:[%s4279_s2 + $0x1e8] sm:$0xff]  ;;  %v1273_v38 = vld [vmem:[%s4279_s2 + $0x200] sm:$0xff] }
  0x2d   : > { %820 = vmatprep.subr.bf16.mxu0 %v2871_v42  ;;  %2278 = vmatprep.subr.bf16.mxu1 %v2873_v43  ;;  %v1216_v42 = vld [vmem:[%s4279_s2 + $0x38] sm:$0xff]  ;;  %v1219_v43 = vld [vmem:[%s4279_s2 + $0x50] sm:$0xff] }
  0x30   : > { %821 = vmatpush1.bf16.msra.mxu0 %v2874_v44  ;;  %2279 = vmatpush3.bf16.msra.mxu1 %v2875_v45  ;;  %v2454_v44 = vpack.c.bf16 %v1212_v41, %v1209_v39  ;;  %v2456_v45 = vpack.c.bf16 %v1219_v43, %v1216_v42  ;;  %v1269_v41 = vld [vmem:[%s4279_s2 + $0x1e0] sm:$0xff]  ;;  %v1272_v42 = vld [vmem:[%s4279_s2 + $0x1f8] sm:$0xff] }
  0x31   : > { %822 = vmatprep.subr.bf16.mxu0 %v2876_v46  ;;  %2280 = vmatprep.subr.bf16.mxu1 %v2878_v47  ;;  %v1215_v46 = vld [vmem:[%s4279_s2 + $0x30] sm:$0xff]  ;;  %v1218_v47 = vld [vmem:[%s4279_s2 + $0x48] sm:$0xff]  ;;  %v1276_v43 = vld [vmem:[%s4279_s2 + $0x218] sm:$0xff] }
  0x34   : > { %823 = vmatpush1.bf16.msra.mxu0 %v2879_v48  ;;  %2281 = vmatpush3.bf16.msra.mxu1 %v2880_v49  ;;  %v1222_v48 = vld [vmem:[%s4279_s2 + $0x68] sm:$0xff]  ;;  %v1225_v49 = vld [vmem:[%s4279_s2 + $0x80] sm:$0xff] }
  0x35   : > { %824 = vmatprep.subr.bf16.mxu0 %v2881_v50  ;;  %2282 = vmatprep.subr.bf16.mxu1 %v2883_v51  ;;  %v2458_v50 = vpack.c.bf16 %v1218_v47, %v1215_v46  ;;  %v2460_v51 = vpack.c.bf16 %v1225_v49, %v1222_v48  ;;  %v1275_v47 = vld [vmem:[%s4279_s2 + $0x210] sm:$0xff]  ;;  %v1278_v48 = vld [vmem:[%s4279_s2 + $0x228] sm:$0xff] }
  0x36   : > { %v1282_v49 = vld [vmem:[%s4279_s2 + $0x248] sm:$0xff] }
  0x38   : > { %825 = vmatpush1.bf16.msra.mxu0 %v2884_v52  ;;  %2283 = vmatpush3.bf16.msra.mxu1 %v2885_v53  ;;  %v1221_v52 = vld [vmem:[%s4279_s2 + $0x60] sm:$0xff]  ;;  %v1224_v53 = vld [vmem:[%s4279_s2 + $0x78] sm:$0xff] }
  0x39   : > { %826 = vmatprep.subr.bf16.mxu0 %v2886_v54  ;;  %2284 = vmatprep.subr.bf16.mxu1 %v2888_v56  ;;  %v1228_v54 = vld [vmem:[%s4279_s2 + $0x98] sm:$0xff]  ;;  %v2462_v56 = vpack.c.bf16 %v1224_v53, %v1221_v52  ;;  %v1281_v53 = vld [vmem:[%s4279_s2 + $0x240] sm:$0xff] }
  0x3a   : > { %v2464_v57 = vpack.c.bf16 %v1231_v55, %v1228_v54  ;;  %v1284_v54 = vld [vmem:[%s4279_s2 + $0x258] sm:$0xff] }
  0x3b   : > { %v1288_v55 = vld [vmem:[%s4279_s2 + $0x278] sm:$0xff] }
  0x3c   : > { %827 = vmatpush1.bf16.msra.mxu0 %v2889_v58  ;;  %2285 = vmatpush3.bf16.msra.mxu1 %v2890_v59  ;;  %v1227_v58 = vld [vmem:[%s4279_s2 + $0x90] sm:$0xff]  ;;  %v1230_v59 = vld [vmem:[%s4279_s2 + $0xa8] sm:$0xff] }
  0x3d   : > { %828 = vmatprep.subr.bf16.mxu0 %v2891_v60  ;;  %2286 = vmatprep.subr.bf16.mxu1 %v2893_v61  ;;  %v1234_v60 = vld [vmem:[%s4279_s2 + $0xc8] sm:$0xff]  ;;  %v1237_v61 = vld [vmem:[%s4279_s2 + $0xe0] sm:$0xff] }
  0x40   : > { %829 = vmatpush1.bf16.msra.mxu0 %v2894_v62  ;;  %2287 = vmatpush3.bf16.msra.mxu1 %v2895_v63  ;;  %v2466_v62 = vpack.c.bf16 %v1230_v59, %v1227_v58  ;;  %v2468_v63 = vpack.c.bf16 %v1237_v61, %v1234_v60  ;;  %v1287_v59 = vld [vmem:[%s4279_s2 + $0x270] sm:$0xff]  ;;  %v1290_v60 = vld [vmem:[%s4279_s2 + $0x288] sm:$0xff] }
  0x41   : > { %830 = vmatprep.subr.bf16.mxu0 %v2896_v0  ;;  %2288 = vmatprep.subr.bf16.mxu1 %v2898_v1  ;;  %v1233_v0 = vld [vmem:[%s4279_s2 + $0xc0] sm:$0xff]  ;;  %v1236_v1 = vld [vmem:[%s4279_s2 + $0xd8] sm:$0xff]  ;;  %v1294_v61 = vld [vmem:[%s4279_s2 + $0x2a8] sm:$0xff] }
  0x44   : > { %831 = vmatpush1.bf16.msra.mxu0 %v2899_v3  ;;  %2289 = vmatpush3.bf16.msra.mxu1 %v2900_v4  ;;  %v1240_v3 = vld [vmem:[%s4279_s2 + $0xf8] sm:$0xff]  ;;  %v1243_v4 = vld [vmem:[%s4279_s2 + $0x110] sm:$0xff] }
  0x45   : > { %2369 = vmatprep.subr.bf16.mxu1 %v2920_v7  ;;  %2453 = vmatprep.subr.bf16.mxu0 %v2452_v40  ;;  %v2492_v40 = vpack.c.bf16 %v1273_v38, %v1270_v37 }
  0x47   : > { %833 = vmatmul.mubr.bf16.vlgmr.msra.gmra.mrb[0].mxu0 %v2190_v5  ;;  %915 = vmatmul.mubr.bf16.vlgmr.msra.gmra.mrb[4].mxu1 %v2190_v5  ;;  %v2470_v5 = vpack.c.bf16 %v1236_v1, %v1233_v0  ;;  %v1293_v1 = vld [vmem:[%s4279_s2 + $0x2a0] sm:$0xff] }
  0x48   : > { %2370 = vmatpush3.bf16.msra.mxu1 %v2903_v6  ;;  %2385 = vmatprep.mubr.msk.bf16.mxu1 %vm2921_vm0, %v2920_v7  ;;  %v2472_v6 = vpack.c.bf16 %v1243_v4, %v1240_v3  ;;  %v1296_v3 = vld [vmem:[%s4279_s2 + $0x2b8] sm:$0xff] }
  0x49   : > { %2371 = vmatprep.subr.bf16.mxu1 %v2920_v7  ;;  %2455 = vmatpush1.bf16.msra.mxu0 %v2454_v44  ;;  %v1279_v44 = vld [vmem:[%s4279_s2 + $0x230] sm:$0xff]  ;;  %v1300_v4 = vld [vmem:[%s4279_s2 + $0x2d8] sm:$0xff] }
  0x4a   : > { %2457 = vmatprep.subr.bf16.mxu0 %v2456_v45  ;;  %v2494_v45 = vpack.c.bf16 %v1272_v42, %v1269_v41  ;;  %v2496_v46 = vpack.c.bf16 %v1279_v44, %v1276_v43 }
  0x4c   : > { %2372 = vmatpush3.bf16.msra.mxu1 %v2904_v8  ;;  %v1239_v8 = vld [vmem:[%s4279_s2 + $0xf0] sm:$0xff] }
  0x4d   : > { %2373 = vmatprep.subr.bf16.mxu1 %v2920_v7  ;;  %2459 = vmatpush1.bf16.msra.mxu0 %v2458_v50  ;;  %v1285_v50 = vld [vmem:[%s4279_s2 + $0x260] sm:$0xff] }
  0x4e   : > { %2461 = vmatprep.subr.bf16.mxu0 %v2460_v51  ;;  %v2498_v51 = vpack.c.bf16 %v1278_v48, %v1275_v47  ;;  %v2500_v52 = vpack.c.bf16 %v1285_v50, %v1282_v49 }
  0x50   : > { %2374 = vmatpush3.bf16.msra.mxu1 %v2905_v9  ;;  %v1242_v9 = vld [vmem:[%s4279_s2 + $0x108] sm:$0xff] }
  0x51   : > { %2375 = vmatprep.subr.bf16.mxu1 %v2920_v7  ;;  %2463 = vmatpush1.bf16.msra.mxu0 %v2462_v56  ;;  %v1291_v56 = vld [vmem:[%s4279_s2 + $0x290] sm:$0xff] }
  0x52   : > { %2465 = vmatprep.subr.bf16.mxu0 %v2464_v57  ;;  %v2502_v57 = vpack.c.bf16 %v1284_v54, %v1281_v53  ;;  %v2504_v58 = vpack.c.bf16 %v1291_v56, %v1288_v55 }
  0x54   : > { %2376 = vmatpush3.bf16.msra.mxu1 %v2906_v10  ;;  %v1246_v10 = vld [vmem:[%s4279_s2 + $0x128] sm:$0xff] }
  0x55   : > { %2377 = vmatprep.subr.bf16.mxu1 %v2920_v7  ;;  %2467 = vmatpush1.bf16.msra.mxu0 %v2466_v62  ;;  %v1297_v62 = vld [vmem:[%s4279_s2 + $0x2c0] sm:$0xff] }
  0x56   : > { %2469 = vmatprep.subr.bf16.mxu0 %v2468_v63  ;;  %v2506_v63 = vpack.c.bf16 %v1290_v60, %v1287_v59  ;;  %v2508_v0 = vpack.c.bf16 %v1297_v62, %v1294_v61 }
  0x58   : > { %2378 = vmatpush3.bf16.msra.mxu1 %v2907_v11  ;;  %v1249_v11 = vld [vmem:[%s4279_s2 + $0x140] sm:$0xff] }
  0x59   : > { %2379 = vmatprep.subr.bf16.mxu1 %v2920_v7  ;;  %2471 = vmatpush1.bf16.msra.mxu0 %v2470_v5  ;;  %v1303_v5 = vld [vmem:[%s4279_s2 + $0x2f0] sm:$0xff] }
  0x5a   : > { %2473 = vmatprep.subr.bf16.mxu0 %v2472_v6  ;;  %v2510_v6 = vpack.c.bf16 %v1296_v3, %v1293_v1 }
  0x5c   : > { %2380 = vmatpush3.bf16.msra.mxu1 %v2908_v12  ;;  %v2474_v12 = vpack.c.bf16 %v1242_v9, %v1239_v8  ;;  %v2512_v8 = vpack.c.bf16 %v1303_v5, %v1300_v4  ;;  %v1299_v9 = vld [vmem:[%s4279_s2 + $0x2d0] sm:$0xff] }
  0x5d   : > { %2381 = vmatprep.subr.bf16.mxu1 %v2920_v7 }
  0x5e   : > { %2475 = vmatpush1.bf16.msra.mxu0 %v2474_v12 }
  0x60   : > { %2382 = vmatpush3.bf16.msra.mxu1 %v2909_v13  ;;  %v2476_v13 = vpack.c.bf16 %v1249_v11, %v1246_v10  ;;  %v1302_v10 = vld [vmem:[%s4279_s2 + $0x2e8] sm:$0xff] }
  0x61   : > { %2383 = vmatprep.subr.bf16.mxu1 %v2920_v7  ;;  %v2514_v11 = vpack.c.bf16 %v1302_v10, %v1299_v9 }
  0x62   : > { %2477 = vmatprep.subr.bf16.mxu0 %v2476_v13 }
  0x64   : > { %2384 = vmatpush3.bf16.msra.mxu1 %v2910_v14  ;;  %v1245_v14 = vld [vmem:[%s4279_s2 + $0x120] sm:$0xff] }
  0x67   : > { %2386 = vmatmul.mubr.bf16.vlgmr.msra.gmra.mrb[8].mxu1 %v3101_v35 }
  0x68   : > { %1160 = vmatprep.mubr.bf16.mxu1 %v2919_v2 }
  0xfa   : > { %v875_v15 = vpop.f32.mrb[0].mxu1 }
  0xfb   : > { %v877_v16 = vpop.f32.mrb[1].mxu1 }
  0xfc   : > { %v879_v17 = vpop.f32.mrb[2].mxu1 }
  0xfd   : > { %v880_v18 = vpop.f32.mrb[3].mxu1  ;;  %v1255_v17 = vld [vmem:[%s4279_s2 + $0x170] sm:$0xff] }
 0x11a   : > { %v834_v19 = vpop.f32.mrb[0].mxu0  ;;  %v2290_v20 = vpop.f32.mrb[4].mxu1 }
 0x11b   : > { %v3231_v21 = vadd.f32 %v875_v15, %v834_v19  ;;  %v836_v22 = vpop.f32.mrb[1].mxu0  ;;  %v2291_v23 = vpop.f32.mrb[5].mxu1  ;;  %v1248_v15 = vld [vmem:[%s4279_s2 + $0x138] sm:$0xff] }
 0x11c   : > { %v3233_v24 = vadd.f32 %v877_v16, %v836_v22  ;;  %v2292_v25 = vadd.f32 %v2291_v23, %v2290_v20  ;;  %v2293_v26 = vpop.f32.mrb[6].mxu1  ;;  %v838_v27 = vpop.f32.mrb[2].mxu0  ;;  %v1252_v16 = vld [vmem:[%s4279_s2 + $0x158] sm:$0xff]  ;;  %v2478_v18 = vpack.c.bf16 %v1248_v15, %v1245_v14  ;;  %v1251_v20 = vld [vmem:[%s4279_s2 + $0x150] sm:$0xff]  ;;  %v1254_v22 = vld [vmem:[%s4279_s2 + $0x168] sm:$0xff] }
 0x11d   : > { %v2294_v28 = vpop.f32.mrb[7].mxu1  ;;  %993 = vrot.lane.b32.xlu1 %v3231_v21, %s2922_s17  ;;  %965 = vrot.lane.b32.xlu0 %v3231_v21, %s2923_s18  ;;  %v839_v29 = vpop.f32.mrb[3].mxu0  ;;  %v2480_v19 = vpack.c.bf16 %v1255_v17, %v1252_v16  ;;  %v1258_v23 = vld [vmem:[%s4279_s2 + $0x188] sm:$0xff]  ;;  %v2482_v26 = vpack.c.bf16 %v1254_v22, %v1251_v20  ;;  %v971_v16 = vlaneseq }
 0x11e   : > { %v2761_v36 = vpack.i.bf16 %v3233_v24, %v3231_v21  ;;  %2479 = vmatpush1.bf16.msra.mxu0 %v2478_v18  ;;  %v1257_v28 = vld [vmem:[%s4279_s2 + $0x180] sm:$0xff]  ;;  %v1260_v29 = vld [vmem:[%s4279_s2 + $0x198] sm:$0xff] }
 0x11f   : > { %2481 = vmatprep.subr.bf16.mxu0 %v2480_v19  ;;  %v3469_v19 = vand.u32 127, %v971_v16 }
 0x121   : > { %1019 = vrot.lane.b32.xlu1 %v3231_v21, %s2924_s19  ;;  %980 = vrot.lane.b32.xlu0 %v3231_v21, %s2925_s20  ;;  %vm973_vm1 = vcmp.lt.s32.totalorder %v3469_v19, 127  ;;  %vm986_vm2 = vcmp.lt.s32.totalorder %v3469_v19, 126  ;;  %vm999_vm3 = vcmp.lt.s32.totalorder %v3469_v19, 110  ;;  %vm1025_vm4 = vcmp.lt.s32.totalorder %v3469_v19, 108 }
 0x122   : > { %2483 = vmatpush1.bf16.msra.mxu0 %v2482_v26  ;;  %vm1012_vm5 = vcmp.lt.s32.totalorder %v3469_v19, 109  ;;  %vm1051_vm6 = vcmp.lt.s32.totalorder %v3469_v19, 91  ;;  %vm1038_vm7 = vcmp.lt.s32.totalorder %v3469_v19, 92  ;;  %vm1064_vm8 = vcmp.lt.s32.totalorder %v3469_v19, 90  ;;  %v1943_v19 = vld [vmem:[%s4280_s3 + $0x218] sm:$0xff] }
 0x125   : > { %1045 = vrot.lane.b32.xlu1 %v3231_v21, %s2926_s21  ;;  %1006 = vrot.lane.b32.xlu0 %v3231_v21, %s2927_s23 }
 0x13a   : > { %v956_v30 = vpop.f32.mrb[8].mxu1 }
 0x13b   : > { %v3247_v31 = vadd.f32 %v2292_v25, %v956_v30  ;;  %v2387_v32 = vpop.f32.mrb[9].mxu1  ;;  %v1261_v25 = vld [vmem:[%s4279_s2 + $0x1a0] sm:$0xff]  ;;  %v1264_v30 = vld [vmem:[%s4279_s2 + $0x1b8] sm:$0xff] }
 0x13c   : > { %v959_v33 = vpop.f32.mrb[10].mxu1  ;;  %v2484_v27 = vpack.c.bf16 %v1261_v25, %v1258_v23  ;;  %v1267_v32 = vld [vmem:[%s4279_s2 + $0x1d0] sm:$0xff] }
 0x13d   : > { %v2388_v34 = vpop.f32.mrb[11].mxu1  ;;  %v2736_v35 = vpack.i.bf16 %v3247_v31, %v3233_v24  ;;  %v2486_v33 = vpack.c.bf16 %v1260_v29, %v1257_v28 }
 0x13e   : > { %2485 = vmatprep.subr.bf16.mxu0 %v2484_v27  ;;  %v2488_v34 = vpack.c.bf16 %v1267_v32, %v1264_v30 }
 0x13f   : > { %2737 = vrot.lane.b32.xlu1 %v2736_v35, %s2925_s20  ;;  %2732 = vrot.lane.b32.xlu0 %v2736_v35, %s2923_s18 }
 0x140   : > { %2487 = vmatpush1.bf16.msra.mxu0 %v2486_v33 }
 0x141   : > { %2489 = vmatprep.subr.bf16.mxu0 %v2488_v34 }
 0x143   : > { %2742 = vrot.lane.b32.xlu1 %v2736_v35, %s2922_s17  ;;  %1032 = vrot.lane.b32.xlu0 %v3231_v21, %s2928_s24 }
 0x147   : > { %2752 = vrot.lane.b32.xlu1 %v2736_v35, %s2924_s19  ;;  %2747 = vrot.lane.b32.xlu0 %v2736_v35, %s2927_s23 }
 0x14b   : > { %2767 = vrot.lane.b32.xlu1 %v2736_v35, %s2926_s21  ;;  %2757 = vrot.lane.b32.xlu0 %v2736_v35, %s2928_s24  ;;  %v1263_v35 = vld [vmem:[%s4279_s2 + $0x1b0] sm:$0xff] }
 0x14f   : > { %1062 = vrot.lane.b32.xlu1 %v3247_v31, %s2929_s25  ;;  %2762 = vrot.lane.b32.xlu0 %v2761_v36, %s2929_s25  ;;  %v1266_v36 = vld [vmem:[%s4279_s2 + $0x1c8] sm:$0xff] }
 0x150   : > { %v2490_v39 = vpack.c.bf16 %v1266_v36, %v1263_v35 }
 0x152   : > { %2491 = vmatpush1.bf16.msra.mxu0 %v2490_v39 }
 0x153   : > { %2493 = vmatprep.subr.bf16.mxu0 %v2492_v40 }
 0x156   : > { %2495 = vmatpush1.bf16.msra.mxu0 %v2494_v45 }
 0x157   : > { %2497 = vmatprep.subr.bf16.mxu0 %v2496_v46 }
 0x15a   : > { %2499 = vmatpush1.bf16.msra.mxu0 %v2498_v51 }
 0x15b   : > { %2501 = vmatprep.subr.bf16.mxu0 %v2500_v52 }
 0x15e   : > { %2503 = vmatpush1.bf16.msra.mxu0 %v2502_v57 }
 0x15f   : > { %2505 = vmatprep.subr.bf16.mxu0 %v2504_v58 }
 0x162   : > { %2507 = vmatpush1.bf16.msra.mxu0 %v2506_v63 }
 0x163   : > { %2509 = vmatprep.subr.bf16.mxu0 %v2508_v0 }
 0x166   : > { %2511 = vmatpush1.bf16.msra.mxu0 %v2510_v6 }
 0x167   : > { %2513 = vmatprep.subr.bf16.mxu0 %v2512_v8 }
 0x16a   : > { %2515 = vmatpush1.bf16.msra.mxu0 %v2514_v11 }
 0x18f   : > { %v3457_v12 = vpop.permute.xlu1 %993  ;;  %v3459_v13 = vpop.permute.xlu0 %965 }
 0x193   : > { %v3461_v14 = vpop.permute.xlu1 %1019  ;;  %v3463_v15 = vpop.permute.xlu0 %980 }
 0x197   : > { %v3465_v17 = vpop.permute.xlu1 %1045  ;;  %v3467_v18 = vpop.permute.xlu0 %1006 }
 0x1b1   : > { %v3471_v20 = vpop.permute.xlu1 %2737  ;;  %v3474_v22 = vpop.permute.xlu0 %2732 }
 0x1b2   : > { %v2735_v23 = vunpack.i.h.bf16 %v3474_v22  ;;  %v2734_v25 = vunpack.i.l.bf16 %v3474_v22  ;;  %v2740_v26 = vunpack.i.h.bf16 %v3471_v20  ;;  %v2739_v27 = vunpack.i.l.bf16 %v3471_v20 }
 0x1b4   : > { %v975_v28 = vsel %vm973_vm1, %v3459_v13, %v2734_v25  ;;  %v974_v33 = vsel %vm973_vm1, %v2734_v25, %v2735_v23  ;;  %v987_v38 = vsel %vm986_vm2, %v2739_v27, %v2740_v26  ;;  %v976_v16 = vsel %vm973_vm1, %v2735_v23, %v3459_v13  ;;  %v1071_v25 = vld [vmem:[%s4281_s4] sm:$0xf] }
 0x1b5   : > { %v1099_v29 = vpack.c.bf16 %v975_v28, %v3231_v21  ;;  %v3486_v30 = vpop.permute.xlu1 %2742  ;;  %v3488_v32 = vpop.permute.xlu0 %1032  ;;  %v1100_v36 = vpack.c.bf16 %v974_v33, %v3233_v24  ;;  %v988_v21 = vsel %vm986_vm2, %v3463_v15, %v2739_v27  ;;  %v1101_v27 = vpack.c.bf16 %v976_v16, %v3247_v31  ;;  %v1214_v33 = vld [vmem:[%s4279_s2 + $0x28] sm:$0xff]  ;;  %v1256_v16 = vld [vmem:[%s4279_s2 + $0x178] sm:$0xff] }
 0x1b6   : > { %v2745_v34 = vunpack.i.h.bf16 %v3486_v30  ;;  %v2744_v35 = vunpack.i.l.bf16 %v3486_v30  ;;  %v989_v13 = vsel %vm986_vm2, %v2740_v26, %v3463_v15 }
 0x1b7   : > { %1128 = vmatprep.subr.bf16.mxu1 %v1100_v36 }
 0x1b8   : > { %v1001_v37 = vsel %vm999_vm3, %v3457_v12, %v2744_v35  ;;  %v1000_v39 = vsel %vm999_vm3, %v2744_v35, %v2745_v34  ;;  %1129 = vmatpush1.bf16.msra.mxu1 %v1099_v29  ;;  %v1002_v28 = vsel %vm999_vm3, %v2745_v34, %v3457_v12  ;;  %v1262_v29 = vld [vmem:[%s4279_s2 + $0x1a8] sm:$0xff]  ;;  %v1265_v34 = vld [vmem:[%s4279_s2 + $0x1c0] sm:$0xff]  ;;  %v1268_v35 = vld [vmem:[%s4279_s2 + $0x1d8] sm:$0xff] }
 0x1b9   : > { %v1102_v24 = vpack.c.bf16 %v1001_v37, %v988_v21  ;;  %v2753_v40 = vpop.permute.xlu1 %2752  ;;  %v2748_v41 = vpop.permute.xlu0 %2747  ;;  %v1103_v42 = vpack.c.bf16 %v1000_v39, %v987_v38  ;;  %v1104_v31 = vpack.c.bf16 %v1002_v28, %v989_v13  ;;  %v2552_v37 = vpack.c.bf16 %v1268_v35, %v1265_v34  ;;  %v1217_v38 = vld [vmem:[%s4279_s2 + $0x40] sm:$0xff]  ;;  %v1220_v39 = vld [vmem:[%s4279_s2 + $0x58] sm:$0xff] }
 0x1ba   : > { %v2755_v43 = vunpack.i.h.bf16 %v2753_v40  ;;  %v2754_v44 = vunpack.i.l.bf16 %v2753_v40  ;;  %v2750_v45 = vunpack.i.h.bf16 %v2748_v41  ;;  %v2749_v46 = vunpack.i.l.bf16 %v2748_v41  ;;  %v1274_v40 = vld [vmem:[%s4279_s2 + $0x208] sm:$0xff]  ;;  %v1309_v28 = vld [vmem:[%s4279_s2 + $0x320] sm:$0xff]  ;;  %v1316_v35 = vld [vmem:[%s4279_s2 + $0x358] sm:$0xff] }
 0x1bb   : > { %1130 = vmatprep.subr.bf16.mxu1 %v1103_v42  ;;  %v2554_v41 = vpack.c.bf16 %v1220_v39, %v1217_v38  ;;  %v1313_v34 = vld [vmem:[%s4279_s2 + $0x340] sm:$0xff] }
 0x1bc   : > { %v1027_v47 = vsel %vm1025_vm4, %v3461_v14, %v2754_v44  ;;  %v1014_v48 = vsel %vm1012_vm5, %v3467_v18, %v2749_v46  ;;  %1131 = vmatpush1.bf16.msra.mxu1 %v1102_v24  ;;  %v1013_v52 = vsel %vm1012_vm5, %v2749_v46, %v2750_v45  ;;  %v1026_v53 = vsel %vm1025_vm4, %v2754_v44, %v2755_v43  ;;  %v1271_v24 = vld [vmem:[%s4279_s2 + $0x1f0] sm:$0xff]  ;;  %v1226_v44 = vld [vmem:[%s4279_s2 + $0x88] sm:$0xff]  ;;  %v1280_v46 = vld [vmem:[%s4279_s2 + $0x238] sm:$0xff] }
 0x1bd   : > { %v1105_v49 = vpack.c.bf16 %v1027_v47, %v1014_v48  ;;  %v2768_v50 = vpop.permute.xlu1 %2767  ;;  %v2758_v51 = vpop.permute.xlu0 %2757  ;;  %v1106_v58 = vpack.c.bf16 %v1026_v53, %v1013_v52  ;;  %v1028_v22 = vsel %vm1025_vm4, %v2755_v43, %v3461_v14  ;;  %v1015_v12 = vsel %vm1012_vm5, %v2750_v45, %v3467_v18  ;;  %v1259_v18 = vld [vmem:[%s4279_s2 + $0x190] sm:$0xff]  ;;  %v1277_v45 = vld [vmem:[%s4279_s2 + $0x220] sm:$0xff]  ;;  %v1286_v52 = vld [vmem:[%s4279_s2 + $0x268] sm:$0xff] }
 0x1be   : > { %v2770_v54 = vunpack.i.h.bf16 %v2768_v50  ;;  %v2769_v55 = vunpack.i.l.bf16 %v2768_v50  ;;  %v2760_v56 = vunpack.i.h.bf16 %v2758_v51  ;;  %v2759_v57 = vunpack.i.l.bf16 %v2758_v51  ;;  %v1223_v43 = vld [vmem:[%s4279_s2 + $0x70] sm:$0xff]  ;;  %v1232_v50 = vld [vmem:[%s4279_s2 + $0xb8] sm:$0xff] }
 0x1bf   : > { %1132 = vmatprep.subr.bf16.mxu1 %v1106_v58  ;;  %v1107_v23 = vpack.c.bf16 %v1028_v22, %v1015_v12  ;;  %v2548_v30 = vpack.c.bf16 %v1262_v29, %v1259_v18  ;;  %v2556_v42 = vpack.c.bf16 %v1274_v40, %v1271_v24  ;;  %v2558_v47 = vpack.c.bf16 %v1226_v44, %v1223_v43  ;;  %v1283_v51 = vld [vmem:[%s4279_s2 + $0x250] sm:$0xff]  ;;  %v1292_v58 = vld [vmem:[%s4279_s2 + $0x298] sm:$0xff]  ;;  %v1305_v22 = vld [vmem:[%s4279_s2 + $0x300] sm:$0xff] }
 0x1c0   : > { %v1053_v59 = vsel %vm1051_vm6, %v3465_v17, %v2769_v55  ;;  %v1040_v60 = vsel %vm1038_vm7, %v3488_v32, %v2759_v57  ;;  %v1039_v62 = vsel %vm1038_vm7, %v2759_v57, %v2760_v56  ;;  %v1052_v63 = vsel %vm1051_vm6, %v2769_v55, %v2770_v54  ;;  %1133 = vmatpush1.bf16.msra.mxu1 %v1105_v49  ;;  %v1229_v49 = vld [vmem:[%s4279_s2 + $0xa0] sm:$0xff]  ;;  %v1235_v55 = vld [vmem:[%s4279_s2 + $0xd0] sm:$0xff]  ;;  %v1308_v12 = vld [vmem:[%s4279_s2 + $0x318] sm:$0xff] }
 0x1c1   : > { %v2763_v61 = vpop.permute.xlu0 %2762  ;;  %v1108_v0 = vpack.c.bf16 %v1053_v59, %v1040_v60  ;;  %v1109_v4 = vpack.c.bf16 %v1052_v63, %v1039_v62  ;;  %v1063_v5 = vpop.permute.xlu1 %1062  ;;  %v1054_v20 = vsel %vm1051_vm6, %v2770_v54, %v3465_v17  ;;  %v1041_v15 = vsel %vm1038_vm7, %v2760_v56, %v3488_v32  ;;  %v1211_v32 = vld [vmem:[%s4279_s2 + $0x10] sm:$0xff]  ;;  %v1238_v56 = vld [vmem:[%s4279_s2 + $0xe8] sm:$0xff]  ;;  %v1289_v57 = vld [vmem:[%s4279_s2 + $0x280] sm:$0xff] }
 0x1c2   : > { %v2765_v1 = vunpack.i.h.bf16 %v2763_v61  ;;  %v2764_v3 = vunpack.i.l.bf16 %v2763_v61  ;;  %v1110_v26 = vpack.c.bf16 %v1054_v20, %v1041_v15  ;;  %v2550_v21 = vpack.c.bf16 %v1214_v33, %v1211_v32  ;;  %v1241_v61 = vld [vmem:[%s4279_s2 + $0x100] sm:$0xff]  ;;  %v1244_v62 = vld [vmem:[%s4279_s2 + $0x118] sm:$0xff]  ;;  %v1295_v63 = vld [vmem:[%s4279_s2 + $0x2b0] sm:$0xff] }
 0x1c3   : > { %1134 = vmatprep.subr.bf16.mxu1 %v1109_v4  ;;  %v2560_v48 = vpack.c.bf16 %v1280_v46, %v1277_v45  ;;  %v2562_v53 = vpack.c.bf16 %v1232_v50, %v1229_v49  ;;  %v2564_v54 = vpack.c.bf16 %v1286_v52, %v1283_v51  ;;  %v2566_v59 = vpack.c.bf16 %v1238_v56, %v1235_v55  ;;  %v1247_v4 = vld [vmem:[%s4279_s2 + $0x130] sm:$0xff]  ;;  %v1310_v20 = vld [vmem:[%s4279_s2 + $0x328] sm:$0xff]  ;;  %v1312_v15 = vld [vmem:[%s4279_s2 + $0x338] sm:$0xff] }
 0x1c4   : > { %v1065_v6 = vsel %vm1064_vm8, %v2765_v1, %v1063_v5  ;;  %v1066_v8 = vsel %vm1064_vm8, %v2764_v3, %v2765_v1  ;;  %1135 = vmatpush1.bf16.msra.mxu1 %v1108_v0  ;;  %v1067_v14 = vsel %vm1064_vm8, %v1063_v5, %v2764_v3  ;;  %v2568_v60 = vpack.c.bf16 %v1292_v58, %v1289_v57  ;;  %v1298_v0 = vld [vmem:[%s4279_s2 + $0x2c8] sm:$0xff]  ;;  %v1317_v40 = vld [vmem:[%s4279_s2 + $0x360] sm:$0xff]  ;;  %v1319_v43 = vld [vmem:[%s4279_s2 + $0x370] sm:$0xff] }
 0x1c5   : > { %v1112_v9 = vpack.c.bf16 %v1065_v6, %v1065_v6  ;;  %v1111_v10 = vpack.c.bf16 %v1066_v8, %v1066_v8  ;;  %v1113_v17 = vpack.c.bf16 %v1067_v14, %v1067_v14  ;;  %v2570_v1 = vpack.c.bf16 %v1244_v62, %v1241_v61  ;;  %v1250_v5 = vld [vmem:[%s4279_s2 + $0x148] sm:$0xff]  ;;  %v1301_v6 = vld [vmem:[%s4279_s2 + $0x2e0] sm:$0xff]  ;;  %v1304_v8 = vld [vmem:[%s4279_s2 + $0x2f8] sm:$0xff] }
 0x1c6   : > { %v2572_v3 = vpack.c.bf16 %v1298_v0, %v1295_v63  ;;  %v1315_v14 = vld [vmem:[%s4279_s2 + $0x350] sm:$0xff]  ;;  %v2518_v18 = vpack.c.bf16 %v1308_v12, %v1305_v22  ;;  %v1314_v33 = vld [vmem:[%s4279_s2 + $0x348] sm:$0xff]  ;;  %v2584_v24 = vpack.c.bf16 %v1316_v35, %v1313_v34  ;;  %v1324_v45 = vld [vmem:[%s4279_s2 + $0x398] sm:$0xff] }
 0x1c7   : > { %2265 = vmatprep.subr.msk.bf16.mxu1 %vm1118_vm9, %v1112_v9  ;;  %v1120_v11 = vsel %vm1118_vm9, %v1111_v10, 0  ;;  %v1126_v36 = vsel %vm1118_vm9, %v1113_v17, 0  ;;  %v2574_v9 = vpack.c.bf16 %v1250_v5, %v1247_v4  ;;  %v2576_v10 = vpack.c.bf16 %v1304_v8, %v1301_v6  ;;  %v1311_v17 = vld [vmem:[%s4279_s2 + $0x330] sm:$0xff]  ;;  %v1322_v44 = vld [vmem:[%s4279_s2 + $0x388] sm:$0xff]  ;;  %v1325_v52 = vld [vmem:[%s4279_s2 + $0x3a0] sm:$0xff] }
 0x1c8   : > { %1137 = vmatpush1.bf16.msra.mxu1 %v1120_v11  ;;  %v1253_v11 = vld [vmem:[%s4279_s2 + $0x160] sm:$0xff]  ;;  %v2520_v32 = vpack.c.bf16 %v1315_v14, %v1312_v15  ;;  %v2522_v39 = vpack.c.bf16 %v1314_v33, %v1311_v17  ;;  %v1327_v46 = vld [vmem:[%s4279_s2 + $0x3b0] sm:$0xff]  ;;  %v1326_v51 = vld [vmem:[%s4279_s2 + $0x3a8] sm:$0xff] }
 0x1c9   : > { %2389 = vmatprep.subr.bf16.mxu1 %v2920_v7  ;;  %v1323_v49 = vld [vmem:[%s4279_s2 + $0x390] sm:$0xff]  ;;  %v2528_v50 = vpack.c.bf16 %v1327_v46, %v1324_v45  ;;  %v1333_v55 = vld [vmem:[%s4279_s2 + $0x3e0] sm:$0xff]  ;;  %v1334_v62 = vld [vmem:[%s4279_s2 + $0x3e8] sm:$0xff] }
 0x1ca   : > { %v2530_v56 = vpack.c.bf16 %v1326_v51, %v1323_v49  ;;  %v1329_v58 = vld [vmem:[%s4279_s2 + $0x3c0] sm:$0xff]  ;;  %v1331_v61 = vld [vmem:[%s4279_s2 + $0x3d0] sm:$0xff]  ;;  %v1336_v63 = vld [vmem:[%s4279_s2 + $0x3f8] sm:$0xff] }
 0x1cb   : > { %2266 = vmatmul.mubr.msk.bf16.vlgmr.msra.gmra.mrb[12].mxu1 %vm1114_vm10, %v1071_v25  ;;  %v1339_v0 = vld [vmem:[%s4279_s2 + $0x410] sm:$0xff]  ;;  %v1338_v6 = vld [vmem:[%s4279_s2 + $0x408] sm:$0xff]  ;;  %v1337_v8 = vld [vmem:[%s4279_s2 + $0x400] sm:$0xff] }
 0x1cc   : > { %2390 = vmatpush3.bf16.msra.mxu1 %v1101_v27  ;;  %2399 = vmatprep.mubr.msk.bf16.mxu1 %vm2921_vm0, %v2920_v7  ;;  %v1306_v27 = vld [vmem:[%s4279_s2 + $0x308] sm:$0xff]  ;;  %v1335_v4 = vld [vmem:[%s4279_s2 + $0x3f0] sm:$0xff]  ;;  %v2536_v5 = vpack.c.bf16 %v1339_v0, %v1336_v63  ;;  %v1344_v22 = vld [vmem:[%s4279_s2 + $0x438] sm:$0xff] }
 0x1cd   : > { %2391 = vmatprep.subr.bf16.mxu1 %v2920_v7  ;;  %v2516_v13 = vpack.c.bf16 %v1309_v28, %v1306_v27  ;;  %v1341_v27 = vld [vmem:[%s4279_s2 + $0x420] sm:$0xff]  ;;  %v1343_v12 = vld [vmem:[%s4279_s2 + $0x430] sm:$0xff]  ;;  %v1348_v15 = vld [vmem:[%s4279_s2 + $0x458] sm:$0xff] }
 0x1ce   : > { %v1351_v14 = vld [vmem:[%s4279_s2 + $0x470] sm:$0xff]  ;;  %v1350_v33 = vld [vmem:[%s4279_s2 + $0x468] sm:$0xff]  ;;  %v1349_v34 = vld [vmem:[%s4279_s2 + $0x460] sm:$0xff] }
 0x1cf   : > { %2517 = vmatprep.subr.bf16.mxu0 %v2516_v13  ;;  %v1352_v35 = vld [vmem:[%s4279_s2 + $0x478] sm:$0xff]  ;;  %v1882_v63 = vld [vmem:[%s4280_s3 + $0x30] sm:$0xff]  ;;  %v1885_v0 = vld [vmem:[%s4280_s3 + $0x48] sm:$0xff] }
 0x1d0   : > { %2392 = vmatpush3.bf16.msra.mxu1 %v1104_v31  ;;  %v2930_v31 = vmov 0.0|0.0  }
 0x1d1   : > { %2393 = vmatprep.subr.bf16.mxu1 %v2920_v7 }
 0x1d4   : > { %2394 = vmatpush3.bf16.msra.mxu1 %v1107_v23  ;;  %v1307_v23 = vld [vmem:[%s4279_s2 + $0x310] sm:$0xff] }
 0x1d5   : > { %2395 = vmatprep.subr.bf16.mxu1 %v2920_v7  ;;  %v2581_v29 = vpack.c.bf16 %v1310_v20, %v1307_v23  ;;  %v1346_v23 = vld [vmem:[%s4279_s2 + $0x448] sm:$0xff] }
 0x1d6   : > { %v2599_v17 = vpack.c.bf16 %v1346_v23, %v1343_v12  ;;  %v1892_v12 = vld [vmem:[%s4280_s3 + $0x80] sm:$0xff]  ;;  %v1894_v23 = vld [vmem:[%s4280_s3 + $0x90] sm:$0xff] }
 0x1d8   : > { %2396 = vmatpush3.bf16.msra.mxu1 %v1110_v26 }
 0x1d9   : > { %2397 = vmatprep.subr.bf16.mxu1 %v2920_v7 }
 0x1dc   : > { %2398 = vmatpush3.bf16.msra.mxu1 %v1126_v36 }
 0x1dd   : > { %2549 = vmatprep.subr.bf16.mxu1 %v2548_v30 }
 0x1df   : > { %2400 = vmatmul.mubr.msk.bf16.vlgmr.msra.gmra.mrb[16].mxu1 %vm1114_vm10, %v1071_v25  ;;  %v2578_v25 = vpack.c.bf16 %v1256_v16, %v1253_v11  ;;  %v1345_v11 = vld [vmem:[%s4279_s2 + $0x440] sm:$0xff]  ;;  %v2538_v16 = vpack.c.bf16 %v1338_v6, %v1335_v4  ;;  %v1886_v6 = vld [vmem:[%s4280_s3 + $0x50] sm:$0xff] }
 0x1e0   : > { %2551 = vmatpush3.bf16.msra.mxu1 %v2550_v21  ;;  %v1318_v21 = vld [vmem:[%s4279_s2 + $0x368] sm:$0xff] }
 0x1e1   : > { %2553 = vmatprep.subr.bf16.mxu1 %v2552_v37  ;;  %v1321_v37 = vld [vmem:[%s4279_s2 + $0x380] sm:$0xff] }
 0x1e4   : > { %2555 = vmatpush3.bf16.msra.mxu1 %v2554_v41  ;;  %v2524_v41 = vpack.c.bf16 %v1321_v37, %v1318_v21  ;;  %v2602_v21 = vpack.c.bf16 %v1352_v35, %v1349_v34  ;;  %v1900_v34 = vld [vmem:[%s4280_s3 + $0xc0] sm:$0xff]  ;;  %v1902_v35 = vld [vmem:[%s4280_s3 + $0xd0] sm:$0xff] }
 0x1e5   : > { %2557 = vmatprep.subr.bf16.mxu1 %v2556_v42  ;;  %v1320_v42 = vld [vmem:[%s4279_s2 + $0x378] sm:$0xff] }
 0x1e8   : > { %2559 = vmatpush3.bf16.msra.mxu1 %v2558_v47  ;;  %v2526_v47 = vpack.c.bf16 %v1320_v42, %v1317_v40  ;;  %v1353_v40 = vld [vmem:[%s4282_s5] sm:$0xff] }
 0x1e9   : > { %2561 = vmatprep.subr.bf16.mxu1 %v2560_v48  ;;  %v2587_v48 = vpack.c.bf16 %v1322_v44, %v1319_v43 }
 0x1ec   : > { %2563 = vmatpush3.bf16.msra.mxu1 %v2562_v53  ;;  %v1328_v53 = vld [vmem:[%s4279_s2 + $0x3b8] sm:$0xff] }
 0x1ed   : > { %2565 = vmatprep.subr.bf16.mxu1 %v2564_v54  ;;  %v1330_v54 = vld [vmem:[%s4279_s2 + $0x3c8] sm:$0xff]  ;;  %v2590_v57 = vpack.c.bf16 %v1328_v53, %v1325_v52 }
 0x1ee   : > { %v1877_v53 = vld [vmem:[%s4280_s3 + $0x8] sm:$0xff] }
 0x1f0   : > { %2567 = vmatpush3.bf16.msra.mxu1 %v2566_v59  ;;  %v2532_v59 = vpack.c.bf16 %v1333_v55, %v1330_v54  ;;  %v1879_v54 = vld [vmem:[%s4280_s3 + $0x18] sm:$0xff]  ;;  %v1876_v55 = vld [vmem:[%s4280_s3] sm:$0xff] }
 0x1f1   : > { %2569 = vmatprep.subr.bf16.mxu1 %v2568_v60  ;;  %v1332_v60 = vld [vmem:[%s4279_s2 + $0x3d8] sm:$0xff] }
 0x1f4   : > { %2571 = vmatpush3.bf16.msra.mxu1 %v2570_v1  ;;  %v2534_v1 = vpack.c.bf16 %v1332_v60, %v1329_v58  ;;  %v1881_v58 = vld [vmem:[%s4280_s3 + $0x28] sm:$0xff] }
 0x1f5   : > { %2573 = vmatprep.subr.bf16.mxu1 %v2572_v3  ;;  %v2593_v3 = vpack.c.bf16 %v1334_v62, %v1331_v61  ;;  %v1880_v62 = vld [vmem:[%s4280_s3 + $0x20] sm:$0xff] }
 0x1f8   : > { %2575 = vmatpush3.bf16.msra.mxu1 %v2574_v9  ;;  %v1340_v9 = vld [vmem:[%s4279_s2 + $0x418] sm:$0xff] }
 0x1f9   : > { %2577 = vmatprep.subr.bf16.mxu1 %v2576_v10  ;;  %v1342_v10 = vld [vmem:[%s4279_s2 + $0x428] sm:$0xff] }
 0x1fa   : > { %v2540_v13 = vpack.c.bf16 %v1345_v11, %v1342_v10 }
 0x1fc   : > { %2579 = vmatpush3.bf16.msra.mxu1 %v2578_v25  ;;  %v2596_v25 = vpack.c.bf16 %v1340_v9, %v1337_v8  ;;  %v1889_v8 = vld [vmem:[%s4280_s3 + $0x68] sm:$0xff]  ;;  %v1891_v9 = vld [vmem:[%s4280_s3 + $0x78] sm:$0xff] }
 0x1fd   : > { %2580 = vmatprep.subr.bf16.mxu1 %v2930_v31  ;;  %v2616_v11 = vpack.c.bf16 %v1891_v9, %v1889_v8  ;;  %v1926_v8 = vld [vmem:[%s4280_s3 + $0x190] sm:$0xff]  ;;  %v1929_v9 = vld [vmem:[%s4280_s3 + $0x1a8] sm:$0xff] }
 0x29e   : > { %v1162_v26 = vpop.f32.mrb[12].mxu1 }
 0x29f   : > { %v1164_v30 = vpop.f32.mrb[13].mxu1 }
 0x2a0   : > { %v1166_v36 = vpop.f32.mrb[14].mxu1  ;;  %1420 = vmatprep.mubr.f32.mxu0 %v1164_v30  ;;  %1562 = vmatprep.mubr.f32.mxu1 %v1164_v30  ;;  %v1347_v30 = vld [vmem:[%s4279_s2 + $0x450] sm:$0xff] }
 0x2a1   : > { %v1167_v38 = vpop.f32.mrb[15].mxu1  ;;  %1421 = vmatmul.mubr.f32.vlgmr.msra.gmra.mrb[4].mxu0 %v1162_v26  ;;  %1563 = vmatmul.mubr.f32.vlgmr.msra.gmra.mrb[20].mxu1 %v1162_v26  ;;  %v2546_v36 = vpack.c.bf16 %v1350_v33, %v1347_v30  ;;  %v1903_v30 = vld [vmem:[%s4280_s3 + $0xd8] sm:$0xff] }
 0x2a2   : > { %2519 = vmatpush1.bf16.msra.mxu0 %v2518_v18  ;;  %2582 = vmatpush3.bf16.msra.mxu1 %v2581_v29  ;;  %v2542_v29 = vpack.c.bf16 %v1344_v22, %v1341_v27  ;;  %v1893_v27 = vld [vmem:[%s4280_s3 + $0x88] sm:$0xff] }
 0x2a3   : > { %2521 = vmatprep.subr.bf16.mxu0 %v2520_v32  ;;  %2583 = vmatprep.subr.bf16.mxu1 %v2930_v31  ;;  %v2544_v32 = vpack.c.bf16 %v1351_v14, %v1348_v15  ;;  %v1899_v15 = vld [vmem:[%s4280_s3 + $0xb8] sm:$0xff]  ;;  %v2622_v14 = vpack.c.bf16 %v1894_v23, %v1892_v12  ;;  %v1932_v23 = vld [vmem:[%s4280_s3 + $0x1c0] sm:$0xff] }
 0x2a4   : > { %1491 = vmatprep.mubr.f32.mxu0 %v2920_v7  ;;  %2435 = vmatprep.mubr.msk.f32.mxu1 %vm2921_vm0, %v2920_v7 }
 0x2a6   : > { %2523 = vmatpush1.bf16.msra.mxu0 %v2522_v39  ;;  %2585 = vmatpush3.bf16.msra.mxu1 %v2584_v24  ;;  %v1355_v24 = vld [vmem:[%s4282_s5 + $0x10] sm:$0xff] }
 0x2a7   : > { %2525 = vmatprep.subr.bf16.mxu0 %v2524_v41  ;;  %2586 = vmatprep.subr.bf16.mxu1 %v2930_v31 }
 0x2aa   : > { %2527 = vmatpush1.bf16.msra.mxu0 %v2526_v47  ;;  %2588 = vmatpush3.bf16.msra.mxu1 %v2587_v48 }
 0x2ab   : > { %2529 = vmatprep.subr.bf16.mxu0 %v2528_v50  ;;  %2589 = vmatprep.subr.bf16.mxu1 %v2930_v31 }
 0x2ae   : > { %2531 = vmatpush1.bf16.msra.mxu0 %v2530_v56  ;;  %2591 = vmatpush3.bf16.msra.mxu1 %v2590_v57  ;;  %v2604_v56 = vpack.c.bf16 %v1879_v54, %v1877_v53  ;;  %v1878_v57 = vld [vmem:[%s4280_s3 + $0x10] sm:$0xff]  ;;  %v1917_v53 = vld [vmem:[%s4280_s3 + $0x148] sm:$0xff]  ;;  %v1919_v54 = vld [vmem:[%s4280_s3 + $0x158] sm:$0xff] }
 0x2af   : > { %2533 = vmatprep.subr.bf16.mxu0 %v2532_v59  ;;  %2592 = vmatprep.subr.bf16.mxu1 %v2930_v31  ;;  %v1883_v59 = vld [vmem:[%s4280_s3 + $0x38] sm:$0xff]  ;;  %v2606_v60 = vpack.c.bf16 %v1878_v57, %v1876_v55  ;;  %v1916_v57 = vld [vmem:[%s4280_s3 + $0x140] sm:$0xff] }
 0x2b0   : > { %v2608_v61 = vpack.c.bf16 %v1883_v59, %v1881_v58  ;;  %v1918_v58 = vld [vmem:[%s4280_s3 + $0x150] sm:$0xff]  ;;  %v1921_v59 = vld [vmem:[%s4280_s3 + $0x168] sm:$0xff] }
 0x2b2   : > { %2535 = vmatpush1.bf16.msra.mxu0 %v2534_v1  ;;  %2594 = vmatpush3.bf16.msra.mxu1 %v2593_v3  ;;  %v1203_v28 = vpop.f32.mrb[16].mxu1  ;;  %v1887_v1 = vld [vmem:[%s4280_s3 + $0x58] sm:$0xff]  ;;  %v2610_v3 = vpack.c.bf16 %v1882_v63, %v1880_v62  ;;  %v1920_v63 = vld [vmem:[%s4280_s3 + $0x160] sm:$0xff] }
 0x2b3   : > { %2537 = vmatprep.subr.bf16.mxu0 %v2536_v5  ;;  %2595 = vmatprep.subr.bf16.mxu1 %v2930_v31  ;;  %v2401_v20 = vpop.f32.mrb[17].mxu1  ;;  %v2612_v4 = vpack.c.bf16 %v1887_v1, %v1885_v0  ;;  %v1884_v5 = vld [vmem:[%s4280_s3 + $0x40] sm:$0xff]  ;;  %v1922_v0 = vld [vmem:[%s4280_s3 + $0x170] sm:$0xff]  ;;  %v1925_v1 = vld [vmem:[%s4280_s3 + $0x188] sm:$0xff] }
 0x2b4   : > { %v1206_v26 = vpop.f32.mrb[18].mxu1  ;;  %v2614_v10 = vpack.c.bf16 %v1886_v6, %v1884_v5  ;;  %v1897_v20 = vld [vmem:[%s4280_s3 + $0xa8] sm:$0xff]  ;;  %v1924_v6 = vld [vmem:[%s4280_s3 + $0x180] sm:$0xff] }
 0x2b5   : > { %v2402_v18 = vpop.f32.mrb[19].mxu1  ;;  %v2624_v26 = vpack.c.bf16 %v1899_v15, %v1897_v20  ;;  %v1934_v20 = vld [vmem:[%s4280_s3 + $0x1d0] sm:$0xff]  ;;  %v1937_v15 = vld [vmem:[%s4280_s3 + $0x1e8] sm:$0xff] }
 0x2b6   : > { %2539 = vmatpush1.bf16.msra.mxu0 %v2538_v16  ;;  %2597 = vmatpush3.bf16.msra.mxu1 %v2596_v25  ;;  %v1888_v16 = vld [vmem:[%s4280_s3 + $0x60] sm:$0xff]  ;;  %v1890_v25 = vld [vmem:[%s4280_s3 + $0x70] sm:$0xff] }
 0x2b7   : > { %2541 = vmatprep.subr.bf16.mxu0 %v2540_v13  ;;  %2598 = vmatprep.subr.bf16.mxu1 %v2930_v31  ;;  %v2618_v13 = vpack.c.bf16 %v1890_v25, %v1888_v16  ;;  %v1896_v18 = vld [vmem:[%s4280_s3 + $0xa0] sm:$0xff] }
 0x2b8   : > { %v1928_v25 = vld [vmem:[%s4280_s3 + $0x1a0] sm:$0xff] }
 0x2ba   : > { %2543 = vmatpush1.bf16.msra.mxu0 %v2542_v29  ;;  %2600 = vmatpush3.bf16.msra.mxu1 %v2599_v17  ;;  %v1898_v29 = vld [vmem:[%s4280_s3 + $0xb0] sm:$0xff]  ;;  %v1901_v17 = vld [vmem:[%s4280_s3 + $0xc8] sm:$0xff] }
 0x2bb   : > { %2545 = vmatprep.subr.bf16.mxu0 %v2544_v32  ;;  %2601 = vmatprep.subr.bf16.mxu1 %v2930_v31  ;;  %v2626_v32 = vpack.c.bf16 %v1898_v29, %v1896_v18  ;;  %v2628_v33 = vpack.c.bf16 %v1903_v30, %v1901_v17  ;;  %v1936_v29 = vld [vmem:[%s4280_s3 + $0x1e0] sm:$0xff]  ;;  %v1938_v17 = vld [vmem:[%s4280_s3 + $0x1f0] sm:$0xff] }
 0x2bc   : > { %v2666_v30 = vpack.c.bf16 %v1938_v17, %v1936_v29 }
 0x2be   : > { %2547 = vmatpush1.bf16.msra.mxu0 %v2546_v36  ;;  %2603 = vmatpush3.bf16.msra.mxu1 %v2602_v21  ;;  %v1905_v36 = vld [vmem:[%s4280_s3 + $0xe8] sm:$0xff]  ;;  %v1907_v21 = vld [vmem:[%s4280_s3 + $0xf8] sm:$0xff] }
 0x2bf   : > { %2605 = vmatprep.subr.bf16.mxu0 %v2604_v56  ;;  %v2644_v56 = vpack.c.bf16 %v1919_v54, %v1917_v53 }
 0x2c1   : > { %1492 = vmatmul.mubr.f32.vlgmr.msra.gmra.mrb[4].mxu0 %v1203_v28  ;;  %2436 = vmatmul.mubr.f32.vlgmr.msra.gmra.mrb[22].mxu1 %v1203_v28  ;;  %v1895_v28 = vld [vmem:[%s4280_s3 + $0x98] sm:$0xff] }
 0x2c2   : > { %1827 = vmatprep.mubr.bf16.mxu1 %v2919_v2  ;;  %v1354_v2 = vld [vmem:[%s4282_s5 + $0x8] sm:$0xff]  ;;  %2607 = vmatpush1.bf16.msra.mxu0 %v2606_v60  ;;  %v2620_v22 = vpack.c.bf16 %v1895_v28, %v1893_v27  ;;  %v1923_v60 = vld [vmem:[%s4280_s3 + $0x178] sm:$0xff]  ;;  %v1930_v27 = vld [vmem:[%s4280_s3 + $0x1b0] sm:$0xff] }
 0x2c3   : > { %2609 = vmatprep.subr.bf16.mxu0 %v2608_v61  ;;  %v2646_v61 = vpack.c.bf16 %v1918_v58, %v1916_v57  ;;  %v2648_v62 = vpack.c.bf16 %v1923_v60, %v1921_v59  ;;  %v1933_v28 = vld [vmem:[%s4280_s3 + $0x1c8] sm:$0xff] }
 0x2c6   : > { %2611 = vmatpush1.bf16.msra.mxu0 %v2610_v3  ;;  %v1927_v3 = vld [vmem:[%s4280_s3 + $0x198] sm:$0xff] }
 0x2c7   : > { %2613 = vmatprep.subr.bf16.mxu0 %v2612_v4  ;;  %v2650_v4 = vpack.c.bf16 %v1922_v0, %v1920_v63  ;;  %v2652_v5 = vpack.c.bf16 %v1927_v3, %v1925_v1 }
 0x2ca   : > { %2615 = vmatpush1.bf16.msra.mxu0 %v2614_v10  ;;  %v1931_v10 = vld [vmem:[%s4280_s3 + $0x1b8] sm:$0xff] }
 0x2cb   : > { %2617 = vmatprep.subr.bf16.mxu0 %v2616_v11  ;;  %v2654_v11 = vpack.c.bf16 %v1926_v8, %v1924_v6  ;;  %v2656_v16 = vpack.c.bf16 %v1931_v10, %v1929_v9 }
 0x2ce   : > { %2619 = vmatpush1.bf16.msra.mxu0 %v2618_v13  ;;  %v1935_v13 = vld [vmem:[%s4280_s3 + $0x1d8] sm:$0xff] }
 0x2cf   : > { %2621 = vmatprep.subr.bf16.mxu0 %v2620_v22  ;;  %v2658_v22 = vpack.c.bf16 %v1930_v27, %v1928_v25  ;;  %v2660_v12 = vpack.c.bf16 %v1935_v13, %v1933_v28 }
 0x2d2   : > { %2623 = vmatpush1.bf16.msra.mxu0 %v2622_v14  ;;  %v1939_v14 = vld [vmem:[%s4280_s3 + $0x1f8] sm:$0xff] }
 0x2d3   : > { %2625 = vmatprep.subr.bf16.mxu0 %v2624_v26  ;;  %v2662_v26 = vpack.c.bf16 %v1934_v20, %v1932_v23  ;;  %v2664_v18 = vpack.c.bf16 %v1939_v14, %v1937_v15 }
 0x2d6   : > { %2627 = vmatpush1.bf16.msra.mxu0 %v2626_v32 }
 0x2d7   : > { %2629 = vmatprep.subr.bf16.mxu0 %v2628_v33 }
 0x374   : > { %v2343_v37 = vpop.f32.mrb[20].mxu1 }
 0x375   : > { %v2344_v38 = vpop.f32.mrb[21].mxu1 }
 0x376   : > { %v2345_v39 = vadd.f32 %v2344_v38, %v2343_v37  ;;  %v2630_v37 = vpack.c.bf16 %v1902_v35, %v1900_v34  ;;  %v2632_v38 = vpack.c.bf16 %v1907_v21, %v1905_v36 }
 0x378   : > { %v1565_v41 = vadd.f32 %v2345_v39, %v1355_v24  ;;  %v1904_v39 = vld [vmem:[%s4280_s3 + $0xe0] sm:$0xff]  ;;  %v1906_v24 = vld [vmem:[%s4280_s3 + $0xf0] sm:$0xff]  ;;  %2631 = vmatpush1.bf16.msra.mxu0 %v2630_v37 }
 0x379   : > { %2633 = vmatprep.subr.bf16.mxu0 %v2632_v38 }
 0x394   : > { %v1493_v42 = vpop.f32.mrb[4].mxu0  ;;  %v1634_v31 = vpop.f32.mrb[22].mxu1 }
 0x395   : > { %v2702_v43 = vadd.f32 %v1493_v42, %v1353_v40  ;;  %v1635_v44 = vadd.f32 %v1634_v31, %v1565_v41  ;;  %v1495_v45 = vpop.f32.mrb[5].mxu0  ;;  %v2437_v46 = vpop.f32.mrb[23].mxu1  ;;  %v1909_v40 = vld [vmem:[%s4280_s3 + $0x108] sm:$0xff]  ;;  %v1911_v41 = vld [vmem:[%s4280_s3 + $0x118] sm:$0xff]  ;;  %v2634_v42 = vpack.c.bf16 %v1906_v24, %v1904_v39 }
 0x396   : > { %v2703_v48 = vadd.f32 %v1495_v45, %v1354_v2  ;;  %v2636_v31 = vpack.c.bf16 %v1911_v41, %v1909_v40  ;;  %v1913_v45 = vld [vmem:[%s4280_s3 + $0x128] sm:$0xff]  ;;  %v1915_v46 = vld [vmem:[%s4280_s3 + $0x138] sm:$0xff] }
 0x397   : > { %v3843_v47 = vmax.f32 %v2702_v43, 0.0  ;;  %v3856_v49 = vmax.f32 %v1635_v44, 0.0  ;;  %v1908_v43 = vld [vmem:[%s4280_s3 + $0x100] sm:$0xff]  ;;  %v1910_v44 = vld [vmem:[%s4280_s3 + $0x110] sm:$0xff]  ;;  %2635 = vmatpush1.bf16.msra.mxu0 %v2634_v42 }
 0x398   : > { %v3858_v50 = vmax.f32 %v2703_v48, 0.0  ;;  %v2638_v2 = vpack.c.bf16 %v1910_v44, %v1908_v43  ;;  %2637 = vmatprep.subr.bf16.mxu0 %v2636_v31  ;;  %v2640_v48 = vpack.c.bf16 %v1915_v46, %v1913_v45 }
 0x399   : > { %1656 = vrot.lane.b32.xlu0 %v3843_v47, %s2925_s20  ;;  %1644 = vrot.lane.b32.xlu1 %v3843_v47, %s2923_s18 }
 0x39a   : > { %v2771_v51 = vpack.i.bf16 %v3856_v49, %v3858_v50  ;;  %v2806_v52 = vpack.i.bf16 %v3858_v50, %v3843_v47 }
 0x39b   : > { %2639 = vmatpush1.bf16.msra.mxu0 %v2638_v2 }
 0x39c   : > { %2641 = vmatprep.subr.bf16.mxu0 %v2640_v48 }
 0x39d   : > { %1680 = vrot.lane.b32.xlu0 %v3843_v47, %s2927_s23  ;;  %1668 = vrot.lane.b32.xlu1 %v3843_v47, %s2922_s17 }
 0x3a1   : > { %1704 = vrot.lane.b32.xlu0 %v3843_v47, %s2928_s24  ;;  %1692 = vrot.lane.b32.xlu1 %v3843_v47, %s2924_s19 }
 0x3a5   : > { %2772 = vrot.lane.b32.xlu0 %v2771_v51, %s2923_s18  ;;  %1716 = vrot.lane.b32.xlu1 %v3843_v47, %s2926_s21 }
 0x3a9   : > { %2777 = vrot.lane.b32.xlu0 %v2771_v51, %s2925_s20  ;;  %2782 = vrot.lane.b32.xlu1 %v2771_v51, %s2922_s17 }
 0x3ad   : > { %2787 = vrot.lane.b32.xlu0 %v2771_v51, %s2927_s23  ;;  %2792 = vrot.lane.b32.xlu1 %v2771_v51, %s2924_s19 }
 0x3b1   : > { %2797 = vrot.lane.b32.xlu0 %v2771_v51, %s2928_s24  ;;  %2802 = vrot.lane.b32.xlu1 %v2771_v51, %s2926_s21  ;;  %v1912_v51 = vld [vmem:[%s4280_s3 + $0x120] sm:$0xff] }
 0x3b5   : > { %2807 = vrot.lane.b32.xlu0 %v2806_v52, %s2929_s25  ;;  %1732 = vrot.lane.b32.xlu1 %v3856_v49, %s2929_s25  ;;  %v1914_v52 = vld [vmem:[%s4280_s3 + $0x130] sm:$0xff] }
 0x3b6   : > { %v2642_v55 = vpack.c.bf16 %v1914_v52, %v1912_v51 }
 0x3b8   : > { %2643 = vmatpush1.bf16.msra.mxu0 %v2642_v55 }
 0x3b9   : > { %2645 = vmatprep.subr.bf16.mxu0 %v2644_v56 }
 0x3bc   : > { %2647 = vmatpush1.bf16.msra.mxu0 %v2646_v61 }
 0x3bd   : > { %2649 = vmatprep.subr.bf16.mxu0 %v2648_v62 }
 0x3c0   : > { %2651 = vmatpush1.bf16.msra.mxu0 %v2650_v4 }
 0x3c1   : > { %2653 = vmatprep.subr.bf16.mxu0 %v2652_v5 }
 0x3c4   : > { %2655 = vmatpush1.bf16.msra.mxu0 %v2654_v11 }
 0x3c5   : > { %2657 = vmatprep.subr.bf16.mxu0 %v2656_v16 }
 0x3c8   : > { %2659 = vmatpush1.bf16.msra.mxu0 %v2658_v22 }
 0x3c9   : > { %2661 = vmatprep.subr.bf16.mxu0 %v2660_v12 }
 0x3cc   : > { %2663 = vmatpush1.bf16.msra.mxu0 %v2662_v26 }
 0x3cd   : > { %2665 = vmatprep.subr.bf16.mxu0 %v2664_v18 }
 0x3d0   : > { %2667 = vmatpush1.bf16.msra.mxu0 %v2666_v30  ;;  %v1740_v30 = vld [vmem:[%s4283_s6] sm:$0x3] }
 0x40b   : > { %v4072_v32 = vpop.permute.xlu0 %1656  ;;  %v4074_v33 = vpop.permute.xlu1 %1644 }
 0x40f   : > { %v4076_v34 = vpop.permute.xlu0 %1680  ;;  %v4078_v35 = vpop.permute.xlu1 %1668 }
 0x413   : > { %v4080_v36 = vpop.permute.xlu0 %1704  ;;  %v4082_v21 = vpop.permute.xlu1 %1692 }
 0x417   : > { %v4084_v37 = vpop.permute.xlu0 %2772  ;;  %v4086_v38 = vpop.permute.xlu1 %1716 }
 0x418   : > { %v2775_v39 = vunpack.i.h.bf16 %v4084_v37  ;;  %v2774_v24 = vunpack.i.l.bf16 %v4084_v37 }
 0x41a   : > { %v1651_v40 = vsel %vm973_vm1, %v4074_v33, %v2774_v24  ;;  %v1650_v41 = vsel %vm973_vm1, %v2774_v24, %v2775_v39  ;;  %v1652_v17 = vsel %vm973_vm1, %v2775_v39, %v4074_v33 }
 0x41b   : > { %v1768_v42 = vpack.c.bf16 %v1651_v40, %v3843_v47  ;;  %v2778_v31 = vpop.permute.xlu0 %2777  ;;  %v2783_v43 = vpop.permute.xlu1 %2782  ;;  %v1769_v44 = vpack.c.bf16 %v1650_v41, %v3858_v50  ;;  %v1770_v37 = vpack.c.bf16 %v1652_v17, %v3856_v49  ;;  %v1971_v17 = vld [vmem:[%s4280_s3 + $0x2f8] sm:$0xff] }
 0x41c   : > { %v2780_v45 = vunpack.i.h.bf16 %v2778_v31  ;;  %v2779_v46 = vunpack.i.l.bf16 %v2778_v31  ;;  %v2785_v2 = vunpack.i.h.bf16 %v2783_v43  ;;  %v2784_v48 = vunpack.i.l.bf16 %v2783_v43  ;;  %v1972_v43 = vld [vmem:[%s4284_s7] sm:$0xf] }
 0x41d   : > { %1795 = vmatprep.subr.bf16.mxu1 %v1769_v44  ;;  %1975 = vperm.xlu0 %2811, %v1972_v43   ;;  %v1940_v44 = vld [vmem:[%s4280_s3 + $0x200] sm:$0xff] }
 0x41e   : > { %v1663_v51 = vsel %vm986_vm2, %v4072_v32, %v2779_v46  ;;  %v1675_v52 = vsel %vm999_vm3, %v4078_v35, %v2784_v48  ;;  %1796 = vmatpush1.bf16.msra.mxu1 %v1768_v42  ;;  %v1662_v50 = vsel %vm986_vm2, %v2779_v46, %v2780_v45  ;;  %v1674_v55 = vsel %vm999_vm3, %v2784_v48, %v2785_v2  ;;  %v1945_v46 = vld [vmem:[%s4280_s3 + $0x228] sm:$0xff] }
 0x41f   : > { %v1771_v53 = vpack.c.bf16 %v1675_v52, %v1663_v51  ;;  %v2788_v47 = vpop.permute.xlu0 %2787  ;;  %v2793_v54 = vpop.permute.xlu1 %2792  ;;  %v1772_v60 = vpack.c.bf16 %v1674_v55, %v1662_v50  ;;  %v1664_v24 = vsel %vm986_vm2, %v2780_v45, %v4072_v32  ;;  %v1676_v40 = vsel %vm999_vm3, %v2785_v2, %v4078_v35  ;;  %v1942_v45 = vld [vmem:[%s4280_s3 + $0x210] sm:$0xff]  ;;  %v1947_v2 = vld [vmem:[%s4280_s3 + $0x238] sm:$0xff]  ;;  %v1949_v55 = vld [vmem:[%s4280_s3 + $0x248] sm:$0xff] }
 0x420   : > { %v2790_v56 = vunpack.i.h.bf16 %v2788_v47  ;;  %v2789_v57 = vunpack.i.l.bf16 %v2788_v47  ;;  %v2795_v58 = vunpack.i.h.bf16 %v2793_v54  ;;  %v2794_v59 = vunpack.i.l.bf16 %v2793_v54  ;;  %v1944_v47 = vld [vmem:[%s4280_s3 + $0x220] sm:$0xff]  ;;  %v1946_v54 = vld [vmem:[%s4280_s3 + $0x230] sm:$0xff] }
 0x421   : > { %1797 = vmatprep.subr.bf16.mxu1 %v1772_v60  ;;  %v1773_v33 = vpack.c.bf16 %v1676_v40, %v1664_v24  ;;  %v2670_v51 = vpack.c.bf16 %v1942_v45, %v1940_v44  ;;  %v1948_v60 = vld [vmem:[%s4280_s3 + $0x240] sm:$0xff] }
 0x422   : > { %v1687_v61 = vsel %vm1012_vm5, %v4076_v34, %v2789_v57  ;;  %v1699_v62 = vsel %vm1025_vm4, %v4082_v21, %v2794_v59  ;;  %v1686_v3 = vsel %vm1012_vm5, %v2789_v57, %v2790_v56  ;;  %v1698_v4 = vsel %vm1025_vm4, %v2794_v59, %v2795_v58  ;;  %1798 = vmatpush1.bf16.msra.mxu1 %v1771_v53 }
 0x423   : > { %v1774_v63 = vpack.c.bf16 %v1699_v62, %v1687_v61  ;;  %v2798_v0 = vpop.permute.xlu0 %2797  ;;  %v2803_v1 = vpop.permute.xlu1 %2802  ;;  %v1775_v10 = vpack.c.bf16 %v1698_v4, %v1686_v3  ;;  %v1688_v49 = vsel %vm1012_vm5, %v2790_v56, %v4076_v34  ;;  %v1700_v32 = vsel %vm1025_vm4, %v2795_v58, %v4082_v21  ;;  %v1951_v56 = vld [vmem:[%s4280_s3 + $0x258] sm:$0xff]  ;;  %v1950_v61 = vld [vmem:[%s4280_s3 + $0x250] sm:$0xff]  ;;  %v1953_v62 = vld [vmem:[%s4280_s3 + $0x268] sm:$0xff] }
 0x424   : > { %v2800_v5 = vunpack.i.h.bf16 %v2798_v0  ;;  %v2799_v6 = vunpack.i.l.bf16 %v2798_v0  ;;  %v2805_v8 = vunpack.i.h.bf16 %v2803_v1  ;;  %v2804_v9 = vunpack.i.l.bf16 %v2803_v1  ;;  %v1952_v1 = vld [vmem:[%s4280_s3 + $0x260] sm:$0xff]  ;;  %v1954_v3 = vld [vmem:[%s4280_s3 + $0x270] sm:$0xff]  ;;  %v1957_v4 = vld [vmem:[%s4280_s3 + $0x288] sm:$0xff] }
 0x425   : > { %1799 = vmatprep.subr.bf16.mxu1 %v1775_v10  ;;  %v1776_v35 = vpack.c.bf16 %v1700_v32, %v1688_v49  ;;  %v2672_v53 = vpack.c.bf16 %v1947_v2, %v1945_v46  ;;  %v2674_v58 = vpack.c.bf16 %v1946_v54, %v1944_v47  ;;  %v2676_v59 = vpack.c.bf16 %v1951_v56, %v1949_v55  ;;  %v1958_v10 = vld [vmem:[%s4280_s3 + $0x290] sm:$0xff] }
 0x426   : > { %v1711_v11 = vsel %vm1038_vm7, %v4080_v36, %v2799_v6  ;;  %v1723_v16 = vsel %vm1051_vm6, %v4086_v38, %v2804_v9  ;;  %v1710_v27 = vsel %vm1038_vm7, %v2799_v6, %v2800_v5  ;;  %v1722_v28 = vsel %vm1051_vm6, %v2804_v9, %v2805_v8  ;;  %1800 = vmatpush1.bf16.msra.mxu1 %v1774_v63  ;;  %v1955_v63 = vld [vmem:[%s4280_s3 + $0x278] sm:$0xff]  ;;  %v1956_v9 = vld [vmem:[%s4280_s3 + $0x280] sm:$0xff]  ;;  %v1970_v49 = vld [vmem:[%s4280_s3 + $0x2f0] sm:$0xff] }
 0x427   : > { %v2808_v25 = vpop.permute.xlu0 %2807  ;;  %v1777_v13 = vpack.c.bf16 %v1723_v16, %v1711_v11  ;;  %v1778_v23 = vpack.c.bf16 %v1722_v28, %v1710_v27  ;;  %v1733_v20 = vpop.permute.xlu1 %1732  ;;  %v1712_v39 = vsel %vm1038_vm7, %v2800_v5, %v4080_v36  ;;  %v1724_v41 = vsel %vm1051_vm6, %v2805_v8, %v4086_v38  ;;  %v1941_v36 = vld [vmem:[%s4280_s3 + $0x208] sm:$0xff]  ;;  %v1959_v5 = vld [vmem:[%s4280_s3 + $0x298] sm:$0xff]  ;;  %v1960_v28 = vld [vmem:[%s4280_s3 + $0x2a0] sm:$0xff] }
 0x428   : > { %v2810_v22 = vunpack.i.h.bf16 %v2808_v25  ;;  %v2809_v12 = vunpack.i.l.bf16 %v2808_v25  ;;  %v1779_v34 = vpack.c.bf16 %v1724_v41, %v1712_v39  ;;  %v2668_v38 = vpack.c.bf16 %v1943_v19, %v1941_v36  ;;  %v1961_v11 = vld [vmem:[%s4280_s3 + $0x2a8] sm:$0xff]  ;;  %v1963_v16 = vld [vmem:[%s4280_s3 + $0x2b8] sm:$0xff] }
 0x429   : > { %1801 = vmatprep.subr.bf16.mxu1 %v1778_v23  ;;  %v2680_v0 = vpack.c.bf16 %v1955_v63, %v1953_v62  ;;  %v2682_v6 = vpack.c.bf16 %v1954_v3, %v1952_v1  ;;  %v2684_v8 = vpack.c.bf16 %v1959_v5, %v1957_v4  ;;  %v2686_v25 = vpack.c.bf16 %v1958_v10, %v1956_v9 }
 0x42a   : > { %v1734_v15 = vsel %vm1064_vm8, %v2810_v22, %v1733_v20  ;;  %v1735_v14 = vsel %vm1064_vm8, %v2809_v12, %v2810_v22  ;;  %1802 = vmatpush1.bf16.msra.mxu1 %v1777_v13  ;;  %v1736_v42 = vsel %vm1064_vm8, %v1733_v20, %v2809_v12  ;;  %2669 = vmatprep.subr.bf16.mxu0 %v2668_v38  ;;  %v1962_v13 = vld [vmem:[%s4280_s3 + $0x2b0] sm:$0xff]  ;;  %v1965_v22 = vld [vmem:[%s4280_s3 + $0x2c8] sm:$0xff]  ;;  %v1967_v12 = vld [vmem:[%s4280_s3 + $0x2d8] sm:$0xff] }
 0x42b   : > { %v1781_v26 = vpack.c.bf16 %v1734_v15, %v1734_v15  ;;  %v1780_v18 = vpack.c.bf16 %v1735_v14, %v1735_v14  ;;  %v1782_v21 = vpack.c.bf16 %v1736_v42, %v1736_v42  ;;  %v2688_v27 = vpack.c.bf16 %v1963_v16, %v1961_v11  ;;  %v1964_v14 = vld [vmem:[%s4280_s3 + $0x2c0] sm:$0xff] }
 0x42c   : > { %v2690_v23 = vpack.c.bf16 %v1962_v13, %v1960_v28  ;;  %v2692_v15 = vpack.c.bf16 %v1967_v12, %v1965_v22 }
 0x42d   : > { %2268 = vmatprep.subr.msk.bf16.mxu1 %vm1118_vm9, %v1781_v26  ;;  %v1787_v29 = vsel %vm1118_vm9, %v1780_v18, 0  ;;  %v1793_v31 = vsel %vm1118_vm9, %v1782_v21, 0  ;;  %v1966_v26 = vld [vmem:[%s4280_s3 + $0x2d0] sm:$0xff] }
 0x42e   : > { %1804 = vmatpush1.bf16.msra.mxu1 %v1787_v29  ;;  %v1969_v29 = vld [vmem:[%s4280_s3 + $0x2e8] sm:$0xff]  ;;  %v2694_v24 = vpack.c.bf16 %v1966_v26, %v1964_v14 }
 0x42f   : > { %2438 = vmatprep.subr.bf16.mxu1 %v2920_v7  ;;  %v2696_v40 = vpack.c.bf16 %v1971_v17, %v1969_v29 }
 0x431   : > { %2269 = vmatmul.mubr.msk.bf16.vlgmr.msra.gmra.mrb[24].mxu1 %vm1114_vm10, %v1740_v30 }
 0x432   : > { %2439 = vmatpush3.bf16.msra.mxu1 %v1770_v37  ;;  %2448 = vmatprep.mubr.msk.bf16.mxu1 %vm2921_vm0, %v2920_v7 }
 0x433   : > { %2440 = vmatprep.subr.bf16.mxu1 %v2920_v7 }
 0x436   : > { %2441 = vmatpush3.bf16.msra.mxu1 %v1773_v33  ;;  %v1968_v33 = vld [vmem:[%s4280_s3 + $0x2e0] sm:$0xff] }
 0x437   : > { %2442 = vmatprep.subr.bf16.mxu1 %v2920_v7  ;;  %v2698_v32 = vpack.c.bf16 %v1970_v49, %v1968_v33 }
 0x43a   : > { %2443 = vmatpush3.bf16.msra.mxu1 %v1776_v35 }
 0x43b   : > { %2444 = vmatprep.subr.bf16.mxu1 %v2920_v7 }
 0x43e   : > { %2445 = vmatpush3.bf16.msra.mxu1 %v1779_v34 }
 0x43f   : > { %2446 = vmatprep.subr.bf16.mxu1 %v2920_v7 }
 0x442   : > { %2447 = vmatpush3.bf16.msra.mxu1 %v1793_v31 }
 0x445   : > { %2449 = vmatmul.mubr.msk.bf16.vlgmr.msra.gmra.mrb[28].mxu1 %vm1114_vm10, %v1740_v30 }
 0x49c   : > { %v1976_v35 = vpop.permute.xlu0 %1975 }
 0x504   : > { %v1829_v48 = vpop.f32.mrb[24].mxu1 }
 0x505   : > { %v1831_v52 = vpop.f32.mrb[25].mxu1 }
 0x506   : > { %v1833_v50 = vpop.f32.mrb[26].mxu1  ;;  %2042 = vmatprep.mubr.f32.mxu0 %v1831_v52 }
 0x507   : > { %v1834_v57 = vpop.f32.mrb[27].mxu1  ;;  %2043 = vmatmul.mubr.f32.vlgmr.msra.gmra.mrb[6].mxu0 %v1829_v48 }
 0x508   : > { %2671 = vmatpush1.bf16.msra.mxu0 %v2670_v51  ;;  %2113 = vmatprep.mubr.f32.mxu0 %v2920_v7  ;;  %v2678_v7 = vpack.c.bf16 %v1950_v61, %v1948_v60 }
 0x509   : > { %2673 = vmatprep.subr.bf16.mxu0 %v2672_v53 }
 0x50c   : > { %2675 = vmatpush1.bf16.msra.mxu0 %v2674_v58 }
 0x50d   : > { %2677 = vmatprep.subr.bf16.mxu0 %v2676_v59 }
 0x510   : > { %2679 = vmatpush1.bf16.msra.mxu0 %v2678_v7 }
 0x511   : > { %2681 = vmatprep.subr.bf16.mxu0 %v2680_v0 }
 0x514   : > { %2683 = vmatpush1.bf16.msra.mxu0 %v2682_v6 }
 0x515   : > { %2685 = vmatprep.subr.bf16.mxu0 %v2684_v8 }
 0x518   : > { %2687 = vmatpush1.bf16.msra.mxu0 %v2686_v25  ;;  %v1870_v20 = vpop.f32.mrb[28].mxu1 }
 0x519   : > { %2689 = vmatprep.subr.bf16.mxu0 %v2688_v27  ;;  %v2450_v18 = vpop.f32.mrb[29].mxu1 }
 0x51a   : > { %v1873_v30 = vpop.f32.mrb[30].mxu1 }
 0x51b   : > { %v2451_v37 = vpop.f32.mrb[31].mxu1 }
 0x51c   : > { %2691 = vmatpush1.bf16.msra.mxu0 %v2690_v23 }
 0x51d   : > { %2693 = vmatprep.subr.bf16.mxu0 %v2692_v15 }
 0x520   : > { %2695 = vmatpush1.bf16.msra.mxu0 %v2694_v24 }
 0x521   : > { %2697 = vmatprep.subr.bf16.mxu0 %v2696_v40 }
 0x524   : > { %2699 = vmatpush1.bf16.msra.mxu0 %v2698_v32 }
 0x527   : > { %2114 = vmatmul.mubr.f32.vlgmr.msra.gmra.mrb[6].mxu0 %v1870_v20 }
 0x5fa   : > { %v2115_v39 = vpop.f32.mrb[6].mxu0 }
 0x5fb   : > { %v2704_v41 = vadd.f32 %v2115_v39, %v1976_v35  ;;  %v2117_v42 = vpop.f32.mrb[7].mxu0 }
 0x5fc   : > { %v2705_v34 = vadd.f32 %v2117_v42, %v1976_v35 }
 0x5fd   : > { %v2120_v21 = vmax.f32 %v2704_v41, 0.0 }
 0x5fe   : > { %v2121_v31 = vmax.f32 %v2705_v34, 0.0 }
 0x600   : > { %v2124_v36 = vcombine.low %v2120_v21, %v2121_v31 }
 0x602   : > { %2126 = vst [vmem:[%s305_s12] sm:$0xff] %v2124_v36 }
 0x603 PF: > { %s18_s27 = sadd.s32 1, %s2917_s27  }
 0x604   : > { %p15_p4 = scmp.ge.s32.totalorder %s18_s27, 4  }
 0x606   :  { %17 = sbr.rel (!%p15_p4) target bundleno = 1 (0x1), region = 82 }

</bundles_post_ra>
